<compile_context>
chip_gen: v6e
topology: v6e:2x2x1
jax: 0.10.0
libtpu: 0.0.40
codegen_flags: <defaults>
</compile_context>

<pallas_src>
import functools

import jax
import jax.numpy as jnp
from jax.experimental import pallas as pl
from jax.experimental.pallas import tpu as pltpu

HIDDEN = 10
LANES = 128  # lane width of a vreg; batch maps onto this axis


def mlp_kernel(x_ref, w1_ref, b1_ref, w2_ref, b2_ref, w3_ref, b3_ref, o_ref, *, hidden):
    # x_ref: (tm, 128) f32 VMEM tile, batch elements packed lane-dense.
    # SMEM params: w1 (H,), b1 (H,), w2 (H*H,) row-major, b2 (H,), w3 (H,), b3 (1,).
    x = x_ref[...]

    # Layer 1 (in_features == 1): h1[h] = relu(w1[h] * x + b1[h]).
    h1 = [jnp.maximum(w1_ref[h] * x + b1_ref[h], 0.0) for h in range(hidden)]

    # Layers 2 + 3 fused:
    #   out = b3 + sum_j w3[j] * relu(b2[j] + sum_h w2[h, j] * h1[h])
    # Fully unrolled (hidden = 10) scalar-broadcast mul/adds; stays on the VPU.
    out = jnp.full_like(x, b3_ref[0])
    for j in range(hidden):
        s = h1[0] * w2_ref[j]                      # w2[0, j]
        for h in range(1, hidden):
            s = s + h1[h] * w2_ref[h * hidden + j]  # w2[h, j]
        h2j = jnp.maximum(s + b2_ref[j], 0.0)
        out = out + h2j * w3_ref[j]

    o_ref[...] = out


def mlp_forward(x, params, *, tm=1024):
    """x: (N, 1) float32. Returns (N, 1) float32 (same semantics as the PyTorch Net)."""
    w1, b1, w2, b2, w3, b3 = params
    hidden = w2.shape[0]
    N = x.shape[0]

    # Lane-dense layout: flatten batch, pad, reshape to (rows_pad, 128).
    flat = x.reshape(-1).astype(jnp.float32)
    rows = int(pl.cdiv(N, LANES))
    rows8 = int(pl.cdiv(rows, 8)) * 8                 # keep tiles (8,128)-aligned
    tm_eff = min(tm, rows8)                           # adapt tile to small batches
    rows_pad = int(pl.cdiv(rows8, tm_eff)) * tm_eff   # grid covers exactly; tail padded
    pad = rows_pad * LANES - N
    if pad:
        flat = jnp.pad(flat, (0, pad))
    x2d = flat.reshape(rows_pad, LANES)

    grid = (rows_pad // tm_eff,)
    smem = pl.BlockSpec(memory_space=pltpu.MemorySpace.SMEM)
    kernel = functools.partial(mlp_kernel, hidden=hidden)

    out2d = pl.pallas_call(
        kernel,
        out_shape=jax.ShapeDtypeStruct((rows_pad, LANES), jnp.float32),
        grid=grid,
        in_specs=[
            pl.BlockSpec((tm_eff, LANES), lambda i: (i, 0)),  # x tile (lane-dense)
            smem,  # w1 (H,)
            smem,  # b1 (H,)
            smem,  # w2 (H*H,) row-major
            smem,  # b2 (H,)
            smem,  # w3 (H,)
            smem,  # b3 (1,)
        ],
        out_specs=pl.BlockSpec((tm_eff, LANES), lambda i: (i, 0)),
        compiler_params=pltpu.CompilerParams(dimension_semantics=("parallel",)),
    )(
        x2d,
        w1.reshape(hidden),
        b1.reshape(hidden),
        w2.reshape(hidden * hidden),
        b2.reshape(hidden),
        w3.reshape(hidden),
        b3.reshape(1),
    )

    # Undo the lane-dense packing.
    return out2d.reshape(-1)[:N].reshape(N, 1)


def init_params(key, hidden=HIDDEN):
    """Deterministic init matching nn.Linear shapes (weights stored as (in, out))."""
    k1, k2, k3, k4, k5, k6 = jax.random.split(key, 6)
    # Mimic PyTorch's U(-1/sqrt(fan_in), 1/sqrt(fan_in)) init.
    w1 = jax.random.uniform(k1, (1, hidden), jnp.float32, -1.0, 1.0)
    b1 = jax.random.uniform(k2, (hidden,), jnp.float32, -1.0, 1.0)
    bound2 = 1.0 / (hidden ** 0.5)
    w2 = jax.random.uniform(k3, (hidden, hidden), jnp.float32, -bound2, bound2)
    b2 = jax.random.uniform(k4, (hidden,), jnp.float32, -bound2, bound2)
    w3 = jax.random.uniform(k5, (hidden, 1), jnp.float32, -bound2, bound2)
    b3 = jax.random.uniform(k6, (1,), jnp.float32, -bound2, bound2)
    return (w1, b1, w2, b2, w3, b3)


def mlp_reference(x, params):
    w1, b1, w2, b2, w3, b3 = params
    h1 = jnp.maximum(x @ w1 + b1, 0.0)
    h2 = jnp.maximum(h1 @ w2 + b2, 0.0)
    return h2 @ w3 + b3


if __name__ == "__main__":
    key = jax.random.PRNGKey(0)
    kx, kp = jax.random.split(key)
    N = 300  # small batch, not a multiple of 128: exercises the pad/slice path
    x = jax.random.normal(kx, (N, 1), jnp.float32)
    params = init_params(kp)

    out = jax.block_until_ready(mlp_forward(x, params))

    ref = mlp_reference(x, params)
    assert out.shape == (N, 1)
    assert jnp.allclose(out, ref, atol=1e-4, rtol=1e-4), "mismatch vs reference"
    print("KERNEL_OK")
</pallas_src>

<mosaic_0001>
module attributes {stable_mosaic.version = 11 : i64} {
  func.func @mlp_kernel(%arg0: i32, %arg1: memref<8x128xf32, #tpu.memory_space<vmem>>, %arg2: memref<10xf32, #tpu.memory_space<smem>>, %arg3: memref<10xf32, #tpu.memory_space<smem>>, %arg4: memref<100xf32, #tpu.memory_space<smem>>, %arg5: memref<10xf32, #tpu.memory_space<smem>>, %arg6: memref<10xf32, #tpu.memory_space<smem>>, %arg7: memref<1xf32, #tpu.memory_space<smem>>, %arg8: memref<8x128xf32, #tpu.memory_space<vmem>>) attributes {dimension_semantics = [#tpu.dimension_semantics<parallel>], iteration_bounds = array<i64: 1>, scalar_prefetch = 0 : i64, scratch_operands = 0 : i64, tpu.core_type = #tpu.core_type<tc>, window_params = [{transform_indices = @transform_0, window_bounds = array<i64: 8, 128>}, {transform_indices = @transform_1, window_bounds = array<i64: 10>}, {transform_indices = @transform_2, window_bounds = array<i64: 10>}, {transform_indices = @transform_3, window_bounds = array<i64: 100>}, {transform_indices = @transform_4, window_bounds = array<i64: 10>}, {transform_indices = @transform_5, window_bounds = array<i64: 10>}, {transform_indices = @transform_6, window_bounds = array<i64: 1>}, {transform_indices = @transform_7, window_bounds = array<i64: 8, 128>}]} {
    %c0 = arith.constant 0 : index
    %c0_0 = arith.constant 0 : index
    %0 = vector.load %arg1[%c0, %c0_0] : memref<8x128xf32, #tpu.memory_space<vmem>>, vector<8x128xf32>
    %c0_1 = arith.constant 0 : index
    %1 = memref.load %arg2[%c0_1] : memref<10xf32, #tpu.memory_space<smem>>
    %2 = vector.broadcast %1 : f32 to vector<8x128xf32>
    %3 = arith.mulf %2, %0 : vector<8x128xf32>
    %c0_2 = arith.constant 0 : index
    %4 = memref.load %arg3[%c0_2] : memref<10xf32, #tpu.memory_space<smem>>
    %5 = vector.broadcast %4 : f32 to vector<8x128xf32>
    %6 = arith.addf %3, %5 : vector<8x128xf32>
    %cst = arith.constant 0.000000e+00 : f32
    %7 = vector.broadcast %cst : f32 to vector<8x128xf32>
    %8 = arith.maximumf %6, %7 : vector<8x128xf32>
    %c1 = arith.constant 1 : index
    %9 = memref.load %arg2[%c1] : memref<10xf32, #tpu.memory_space<smem>>
    %10 = vector.broadcast %9 : f32 to vector<8x128xf32>
    %11 = arith.mulf %10, %0 : vector<8x128xf32>
    %c1_3 = arith.constant 1 : index
    %12 = memref.load %arg3[%c1_3] : memref<10xf32, #tpu.memory_space<smem>>
    %13 = vector.broadcast %12 : f32 to vector<8x128xf32>
    %14 = arith.addf %11, %13 : vector<8x128xf32>
    %cst_4 = arith.constant 0.000000e+00 : f32
    %15 = vector.broadcast %cst_4 : f32 to vector<8x128xf32>
    %16 = arith.maximumf %14, %15 : vector<8x128xf32>
    %c2 = arith.constant 2 : index
    %17 = memref.load %arg2[%c2] : memref<10xf32, #tpu.memory_space<smem>>
    %18 = vector.broadcast %17 : f32 to vector<8x128xf32>
    %19 = arith.mulf %18, %0 : vector<8x128xf32>
    %c2_5 = arith.constant 2 : index
    %20 = memref.load %arg3[%c2_5] : memref<10xf32, #tpu.memory_space<smem>>
    %21 = vector.broadcast %20 : f32 to vector<8x128xf32>
    %22 = arith.addf %19, %21 : vector<8x128xf32>
    %cst_6 = arith.constant 0.000000e+00 : f32
    %23 = vector.broadcast %cst_6 : f32 to vector<8x128xf32>
    %24 = arith.maximumf %22, %23 : vector<8x128xf32>
    %c3 = arith.constant 3 : index
    %25 = memref.load %arg2[%c3] : memref<10xf32, #tpu.memory_space<smem>>
    %26 = vector.broadcast %25 : f32 to vector<8x128xf32>
    %27 = arith.mulf %26, %0 : vector<8x128xf32>
    %c3_7 = arith.constant 3 : index
    %28 = memref.load %arg3[%c3_7] : memref<10xf32, #tpu.memory_space<smem>>
    %29 = vector.broadcast %28 : f32 to vector<8x128xf32>
    %30 = arith.addf %27, %29 : vector<8x128xf32>
    %cst_8 = arith.constant 0.000000e+00 : f32
    %31 = vector.broadcast %cst_8 : f32 to vector<8x128xf32>
    %32 = arith.maximumf %30, %31 : vector<8x128xf32>
    %c4 = arith.constant 4 : index
    %33 = memref.load %arg2[%c4] : memref<10xf32, #tpu.memory_space<smem>>
    %34 = vector.broadcast %33 : f32 to vector<8x128xf32>
    %35 = arith.mulf %34, %0 : vector<8x128xf32>
    %c4_9 = arith.constant 4 : index
    %36 = memref.load %arg3[%c4_9] : memref<10xf32, #tpu.memory_space<smem>>
    %37 = vector.broadcast %36 : f32 to vector<8x128xf32>
    %38 = arith.addf %35, %37 : vector<8x128xf32>
    %cst_10 = arith.constant 0.000000e+00 : f32
    %39 = vector.broadcast %cst_10 : f32 to vector<8x128xf32>
    %40 = arith.maximumf %38, %39 : vector<8x128xf32>
    %c5 = arith.constant 5 : index
    %41 = memref.load %arg2[%c5] : memref<10xf32, #tpu.memory_space<smem>>
    %42 = vector.broadcast %41 : f32 to vector<8x128xf32>
    %43 = arith.mulf %42, %0 : vector<8x128xf32>
    %c5_11 = arith.constant 5 : index
    %44 = memref.load %arg3[%c5_11] : memref<10xf32, #tpu.memory_space<smem>>
    %45 = vector.broadcast %44 : f32 to vector<8x128xf32>
    %46 = arith.addf %43, %45 : vector<8x128xf32>
    %cst_12 = arith.constant 0.000000e+00 : f32
    %47 = vector.broadcast %cst_12 : f32 to vector<8x128xf32>
    %48 = arith.maximumf %46, %47 : vector<8x128xf32>
    %c6 = arith.constant 6 : index
    %49 = memref.load %arg2[%c6] : memref<10xf32, #tpu.memory_space<smem>>
    %50 = vector.broadcast %49 : f32 to vector<8x128xf32>
    %51 = arith.mulf %50, %0 : vector<8x128xf32>
    %c6_13 = arith.constant 6 : index
    %52 = memref.load %arg3[%c6_13] : memref<10xf32, #tpu.memory_space<smem>>
    %53 = vector.broadcast %52 : f32 to vector<8x128xf32>
    %54 = arith.addf %51, %53 : vector<8x128xf32>
    %cst_14 = arith.constant 0.000000e+00 : f32
    %55 = vector.broadcast %cst_14 : f32 to vector<8x128xf32>
    %56 = arith.maximumf %54, %55 : vector<8x128xf32>
    %c7 = arith.constant 7 : index
    %57 = memref.load %arg2[%c7] : memref<10xf32, #tpu.memory_space<smem>>
    %58 = vector.broadcast %57 : f32 to vector<8x128xf32>
    %59 = arith.mulf %58, %0 : vector<8x128xf32>
    %c7_15 = arith.constant 7 : index
    %60 = memref.load %arg3[%c7_15] : memref<10xf32, #tpu.memory_space<smem>>
    %61 = vector.broadcast %60 : f32 to vector<8x128xf32>
    %62 = arith.addf %59, %61 : vector<8x128xf32>
    %cst_16 = arith.constant 0.000000e+00 : f32
    %63 = vector.broadcast %cst_16 : f32 to vector<8x128xf32>
    %64 = arith.maximumf %62, %63 : vector<8x128xf32>
    %c8 = arith.constant 8 : index
    %65 = memref.load %arg2[%c8] : memref<10xf32, #tpu.memory_space<smem>>
    %66 = vector.broadcast %65 : f32 to vector<8x128xf32>
    %67 = arith.mulf %66, %0 : vector<8x128xf32>
    %c8_17 = arith.constant 8 : index
    %68 = memref.load %arg3[%c8_17] : memref<10xf32, #tpu.memory_space<smem>>
    %69 = vector.broadcast %68 : f32 to vector<8x128xf32>
    %70 = arith.addf %67, %69 : vector<8x128xf32>
    %cst_18 = arith.constant 0.000000e+00 : f32
    %71 = vector.broadcast %cst_18 : f32 to vector<8x128xf32>
    %72 = arith.maximumf %70, %71 : vector<8x128xf32>
    %c9 = arith.constant 9 : index
    %73 = memref.load %arg2[%c9] : memref<10xf32, #tpu.memory_space<smem>>
    %74 = vector.broadcast %73 : f32 to vector<8x128xf32>
    %75 = arith.mulf %74, %0 : vector<8x128xf32>
    %c9_19 = arith.constant 9 : index
    %76 = memref.load %arg3[%c9_19] : memref<10xf32, #tpu.memory_space<smem>>
    %77 = vector.broadcast %76 : f32 to vector<8x128xf32>
    %78 = arith.addf %75, %77 : vector<8x128xf32>
    %cst_20 = arith.constant 0.000000e+00 : f32
    %79 = vector.broadcast %cst_20 : f32 to vector<8x128xf32>
    %80 = arith.maximumf %78, %79 : vector<8x128xf32>
    %c0_21 = arith.constant 0 : index
    %81 = memref.load %arg7[%c0_21] : memref<1xf32, #tpu.memory_space<smem>>
    %82 = vector.broadcast %81 : f32 to vector<8x128xf32>
    %c0_22 = arith.constant 0 : index
    %83 = memref.load %arg4[%c0_22] : memref<100xf32, #tpu.memory_space<smem>>
    %84 = vector.broadcast %83 : f32 to vector<8x128xf32>
    %85 = arith.mulf %8, %84 : vector<8x128xf32>
    %c10 = arith.constant 10 : index
    %86 = memref.load %arg4[%c10] : memref<100xf32, #tpu.memory_space<smem>>
    %87 = vector.broadcast %86 : f32 to vector<8x128xf32>
    %88 = arith.mulf %16, %87 : vector<8x128xf32>
    %89 = arith.addf %85, %88 : vector<8x128xf32>
    %c20 = arith.constant 20 : index
    %90 = memref.load %arg4[%c20] : memref<100xf32, #tpu.memory_space<smem>>
    %91 = vector.broadcast %90 : f32 to vector<8x128xf32>
    %92 = arith.mulf %24, %91 : vector<8x128xf32>
    %93 = arith.addf %89, %92 : vector<8x128xf32>
    %c30 = arith.constant 30 : index
    %94 = memref.load %arg4[%c30] : memref<100xf32, #tpu.memory_space<smem>>
    %95 = vector.broadcast %94 : f32 to vector<8x128xf32>
    %96 = arith.mulf %32, %95 : vector<8x128xf32>
    %97 = arith.addf %93, %96 : vector<8x128xf32>
    %c40 = arith.constant 40 : index
    %98 = memref.load %arg4[%c40] : memref<100xf32, #tpu.memory_space<smem>>
    %99 = vector.broadcast %98 : f32 to vector<8x128xf32>
    %100 = arith.mulf %40, %99 : vector<8x128xf32>
    %101 = arith.addf %97, %100 : vector<8x128xf32>
    %c50 = arith.constant 50 : index
    %102 = memref.load %arg4[%c50] : memref<100xf32, #tpu.memory_space<smem>>
    %103 = vector.broadcast %102 : f32 to vector<8x128xf32>
    %104 = arith.mulf %48, %103 : vector<8x128xf32>
    %105 = arith.addf %101, %104 : vector<8x128xf32>
    %c60 = arith.constant 60 : index
    %106 = memref.load %arg4[%c60] : memref<100xf32, #tpu.memory_space<smem>>
    %107 = vector.broadcast %106 : f32 to vector<8x128xf32>
    %108 = arith.mulf %56, %107 : vector<8x128xf32>
    %109 = arith.addf %105, %108 : vector<8x128xf32>
    %c70 = arith.constant 70 : index
    %110 = memref.load %arg4[%c70] : memref<100xf32, #tpu.memory_space<smem>>
    %111 = vector.broadcast %110 : f32 to vector<8x128xf32>
    %112 = arith.mulf %64, %111 : vector<8x128xf32>
    %113 = arith.addf %109, %112 : vector<8x128xf32>
    %c80 = arith.constant 80 : index
    %114 = memref.load %arg4[%c80] : memref<100xf32, #tpu.memory_space<smem>>
    %115 = vector.broadcast %114 : f32 to vector<8x128xf32>
    %116 = arith.mulf %72, %115 : vector<8x128xf32>
    %117 = arith.addf %113, %116 : vector<8x128xf32>
    %c90 = arith.constant 90 : index
    %118 = memref.load %arg4[%c90] : memref<100xf32, #tpu.memory_space<smem>>
    %119 = vector.broadcast %118 : f32 to vector<8x128xf32>
    %120 = arith.mulf %80, %119 : vector<8x128xf32>
    %121 = arith.addf %117, %120 : vector<8x128xf32>
    %c0_23 = arith.constant 0 : index
    %122 = memref.load %arg5[%c0_23] : memref<10xf32, #tpu.memory_space<smem>>
    %123 = vector.broadcast %122 : f32 to vector<8x128xf32>
    %124 = arith.addf %121, %123 : vector<8x128xf32>
    %cst_24 = arith.constant 0.000000e+00 : f32
    %125 = vector.broadcast %cst_24 : f32 to vector<8x128xf32>
    %126 = arith.maximumf %124, %125 : vector<8x128xf32>
    %c0_25 = arith.constant 0 : index
    %127 = memref.load %arg6[%c0_25] : memref<10xf32, #tpu.memory_space<smem>>
    %128 = vector.broadcast %127 : f32 to vector<8x128xf32>
    %129 = arith.mulf %126, %128 : vector<8x128xf32>
    %130 = arith.addf %82, %129 : vector<8x128xf32>
    %c1_26 = arith.constant 1 : index
    %131 = memref.load %arg4[%c1_26] : memref<100xf32, #tpu.memory_space<smem>>
    %132 = vector.broadcast %131 : f32 to vector<8x128xf32>
    %133 = arith.mulf %8, %132 : vector<8x128xf32>
    %c11 = arith.constant 11 : index
    %134 = memref.load %arg4[%c11] : memref<100xf32, #tpu.memory_space<smem>>
    %135 = vector.broadcast %134 : f32 to vector<8x128xf32>
    %136 = arith.mulf %16, %135 : vector<8x128xf32>
    %137 = arith.addf %133, %136 : vector<8x128xf32>
    %c21 = arith.constant 21 : index
    %138 = memref.load %arg4[%c21] : memref<100xf32, #tpu.memory_space<smem>>
    %139 = vector.broadcast %138 : f32 to vector<8x128xf32>
    %140 = arith.mulf %24, %139 : vector<8x128xf32>
    %141 = arith.addf %137, %140 : vector<8x128xf32>
    %c31 = arith.constant 31 : index
    %142 = memref.load %arg4[%c31] : memref<100xf32, #tpu.memory_space<smem>>
    %143 = vector.broadcast %142 : f32 to vector<8x128xf32>
    %144 = arith.mulf %32, %143 : vector<8x128xf32>
    %145 = arith.addf %141, %144 : vector<8x128xf32>
    %c41 = arith.constant 41 : index
    %146 = memref.load %arg4[%c41] : memref<100xf32, #tpu.memory_space<smem>>
    %147 = vector.broadcast %146 : f32 to vector<8x128xf32>
    %148 = arith.mulf %40, %147 : vector<8x128xf32>
    %149 = arith.addf %145, %148 : vector<8x128xf32>
    %c51 = arith.constant 51 : index
    %150 = memref.load %arg4[%c51] : memref<100xf32, #tpu.memory_space<smem>>
    %151 = vector.broadcast %150 : f32 to vector<8x128xf32>
    %152 = arith.mulf %48, %151 : vector<8x128xf32>
    %153 = arith.addf %149, %152 : vector<8x128xf32>
    %c61 = arith.constant 61 : index
    %154 = memref.load %arg4[%c61] : memref<100xf32, #tpu.memory_space<smem>>
    %155 = vector.broadcast %154 : f32 to vector<8x128xf32>
    %156 = arith.mulf %56, %155 : vector<8x128xf32>
    %157 = arith.addf %153, %156 : vector<8x128xf32>
    %c71 = arith.constant 71 : index
    %158 = memref.load %arg4[%c71] : memref<100xf32, #tpu.memory_space<smem>>
    %159 = vector.broadcast %158 : f32 to vector<8x128xf32>
    %160 = arith.mulf %64, %159 : vector<8x128xf32>
    %161 = arith.addf %157, %160 : vector<8x128xf32>
    %c81 = arith.constant 81 : index
    %162 = memref.load %arg4[%c81] : memref<100xf32, #tpu.memory_space<smem>>
    %163 = vector.broadcast %162 : f32 to vector<8x128xf32>
    %164 = arith.mulf %72, %163 : vector<8x128xf32>
    %165 = arith.addf %161, %164 : vector<8x128xf32>
    %c91 = arith.constant 91 : index
    %166 = memref.load %arg4[%c91] : memref<100xf32, #tpu.memory_space<smem>>
    %167 = vector.broadcast %166 : f32 to vector<8x128xf32>
    %168 = arith.mulf %80, %167 : vector<8x128xf32>
    %169 = arith.addf %165, %168 : vector<8x128xf32>
    %c1_27 = arith.constant 1 : index
    %170 = memref.load %arg5[%c1_27] : memref<10xf32, #tpu.memory_space<smem>>
    %171 = vector.broadcast %170 : f32 to vector<8x128xf32>
    %172 = arith.addf %169, %171 : vector<8x128xf32>
    %cst_28 = arith.constant 0.000000e+00 : f32
    %173 = vector.broadcast %cst_28 : f32 to vector<8x128xf32>
    %174 = arith.maximumf %172, %173 : vector<8x128xf32>
    %c1_29 = arith.constant 1 : index
    %175 = memref.load %arg6[%c1_29] : memref<10xf32, #tpu.memory_space<smem>>
    %176 = vector.broadcast %175 : f32 to vector<8x128xf32>
    %177 = arith.mulf %174, %176 : vector<8x128xf32>
    %178 = arith.addf %130, %177 : vector<8x128xf32>
    %c2_30 = arith.constant 2 : index
    %179 = memref.load %arg4[%c2_30] : memref<100xf32, #tpu.memory_space<smem>>
    %180 = vector.broadcast %179 : f32 to vector<8x128xf32>
    %181 = arith.mulf %8, %180 : vector<8x128xf32>
    %c12 = arith.constant 12 : index
    %182 = memref.load %arg4[%c12] : memref<100xf32, #tpu.memory_space<smem>>
    %183 = vector.broadcast %182 : f32 to vector<8x128xf32>
    %184 = arith.mulf %16, %183 : vector<8x128xf32>
    %185 = arith.addf %181, %184 : vector<8x128xf32>
    %c22 = arith.constant 22 : index
    %186 = memref.load %arg4[%c22] : memref<100xf32, #tpu.memory_space<smem>>
    %187 = vector.broadcast %186 : f32 to vector<8x128xf32>
    %188 = arith.mulf %24, %187 : vector<8x128xf32>
    %189 = arith.addf %185, %188 : vector<8x128xf32>
    %c32 = arith.constant 32 : index
    %190 = memref.load %arg4[%c32] : memref<100xf32, #tpu.memory_space<smem>>
    %191 = vector.broadcast %190 : f32 to vector<8x128xf32>
    %192 = arith.mulf %32, %191 : vector<8x128xf32>
    %193 = arith.addf %189, %192 : vector<8x128xf32>
    %c42 = arith.constant 42 : index
    %194 = memref.load %arg4[%c42] : memref<100xf32, #tpu.memory_space<smem>>
    %195 = vector.broadcast %194 : f32 to vector<8x128xf32>
    %196 = arith.mulf %40, %195 : vector<8x128xf32>
    %197 = arith.addf %193, %196 : vector<8x128xf32>
    %c52 = arith.constant 52 : index
    %198 = memref.load %arg4[%c52] : memref<100xf32, #tpu.memory_space<smem>>
    %199 = vector.broadcast %198 : f32 to vector<8x128xf32>
    %200 = arith.mulf %48, %199 : vector<8x128xf32>
    %201 = arith.addf %197, %200 : vector<8x128xf32>
    %c62 = arith.constant 62 : index
    %202 = memref.load %arg4[%c62] : memref<100xf32, #tpu.memory_space<smem>>
    %203 = vector.broadcast %202 : f32 to vector<8x128xf32>
    %204 = arith.mulf %56, %203 : vector<8x128xf32>
    %205 = arith.addf %201, %204 : vector<8x128xf32>
    %c72 = arith.constant 72 : index
    %206 = memref.load %arg4[%c72] : memref<100xf32, #tpu.memory_space<smem>>
    %207 = vector.broadcast %206 : f32 to vector<8x128xf32>
    %208 = arith.mulf %64, %207 : vector<8x128xf32>
    %209 = arith.addf %205, %208 : vector<8x128xf32>
    %c82 = arith.constant 82 : index
    %210 = memref.load %arg4[%c82] : memref<100xf32, #tpu.memory_space<smem>>
    %211 = vector.broadcast %210 : f32 to vector<8x128xf32>
    %212 = arith.mulf %72, %211 : vector<8x128xf32>
    %213 = arith.addf %209, %212 : vector<8x128xf32>
    %c92 = arith.constant 92 : index
    %214 = memref.load %arg4[%c92] : memref<100xf32, #tpu.memory_space<smem>>
    %215 = vector.broadcast %214 : f32 to vector<8x128xf32>
    %216 = arith.mulf %80, %215 : vector<8x128xf32>
    %217 = arith.addf %213, %216 : vector<8x128xf32>
    %c2_31 = arith.constant 2 : index
    %218 = memref.load %arg5[%c2_31] : memref<10xf32, #tpu.memory_space<smem>>
    %219 = vector.broadcast %218 : f32 to vector<8x128xf32>
    %220 = arith.addf %217, %219 : vector<8x128xf32>
    %cst_32 = arith.constant 0.000000e+00 : f32
    %221 = vector.broadcast %cst_32 : f32 to vector<8x128xf32>
    %222 = arith.maximumf %220, %221 : vector<8x128xf32>
    %c2_33 = arith.constant 2 : index
    %223 = memref.load %arg6[%c2_33] : memref<10xf32, #tpu.memory_space<smem>>
    %224 = vector.broadcast %223 : f32 to vector<8x128xf32>
    %225 = arith.mulf %222, %224 : vector<8x128xf32>
    %226 = arith.addf %178, %225 : vector<8x128xf32>
    %c3_34 = arith.constant 3 : index
    %227 = memref.load %arg4[%c3_34] : memref<100xf32, #tpu.memory_space<smem>>
    %228 = vector.broadcast %227 : f32 to vector<8x128xf32>
    %229 = arith.mulf %8, %228 : vector<8x128xf32>
    %c13 = arith.constant 13 : index
    %230 = memref.load %arg4[%c13] : memref<100xf32, #tpu.memory_space<smem>>
    %231 = vector.broadcast %230 : f32 to vector<8x128xf32>
    %232 = arith.mulf %16, %231 : vector<8x128xf32>
    %233 = arith.addf %229, %232 : vector<8x128xf32>
    %c23 = arith.constant 23 : index
    %234 = memref.load %arg4[%c23] : memref<100xf32, #tpu.memory_space<smem>>
    %235 = vector.broadcast %234 : f32 to vector<8x128xf32>
    %236 = arith.mulf %24, %235 : vector<8x128xf32>
    %237 = arith.addf %233, %236 : vector<8x128xf32>
    %c33 = arith.constant 33 : index
    %238 = memref.load %arg4[%c33] : memref<100xf32, #tpu.memory_space<smem>>
    %239 = vector.broadcast %238 : f32 to vector<8x128xf32>
    %240 = arith.mulf %32, %239 : vector<8x128xf32>
    %241 = arith.addf %237, %240 : vector<8x128xf32>
    %c43 = arith.constant 43 : index
    %242 = memref.load %arg4[%c43] : memref<100xf32, #tpu.memory_space<smem>>
    %243 = vector.broadcast %242 : f32 to vector<8x128xf32>
    %244 = arith.mulf %40, %243 : vector<8x128xf32>
    %245 = arith.addf %241, %244 : vector<8x128xf32>
    %c53 = arith.constant 53 : index
    %246 = memref.load %arg4[%c53] : memref<100xf32, #tpu.memory_space<smem>>
    %247 = vector.broadcast %246 : f32 to vector<8x128xf32>
    %248 = arith.mulf %48, %247 : vector<8x128xf32>
    %249 = arith.addf %245, %248 : vector<8x128xf32>
    %c63 = arith.constant 63 : index
    %250 = memref.load %arg4[%c63] : memref<100xf32, #tpu.memory_space<smem>>
    %251 = vector.broadcast %250 : f32 to vector<8x128xf32>
    %252 = arith.mulf %56, %251 : vector<8x128xf32>
    %253 = arith.addf %249, %252 : vector<8x128xf32>
    %c73 = arith.constant 73 : index
    %254 = memref.load %arg4[%c73] : memref<100xf32, #tpu.memory_space<smem>>
    %255 = vector.broadcast %254 : f32 to vector<8x128xf32>
    %256 = arith.mulf %64, %255 : vector<8x128xf32>
    %257 = arith.addf %253, %256 : vector<8x128xf32>
    %c83 = arith.constant 83 : index
    %258 = memref.load %arg4[%c83] : memref<100xf32, #tpu.memory_space<smem>>
    %259 = vector.broadcast %258 : f32 to vector<8x128xf32>
    %260 = arith.mulf %72, %259 : vector<8x128xf32>
    %261 = arith.addf %257, %260 : vector<8x128xf32>
    %c93 = arith.constant 93 : index
    %262 = memref.load %arg4[%c93] : memref<100xf32, #tpu.memory_space<smem>>
    %263 = vector.broadcast %262 : f32 to vector<8x128xf32>
    %264 = arith.mulf %80, %263 : vector<8x128xf32>
    %265 = arith.addf %261, %264 : vector<8x128xf32>
    %c3_35 = arith.constant 3 : index
    %266 = memref.load %arg5[%c3_35] : memref<10xf32, #tpu.memory_space<smem>>
    %267 = vector.broadcast %266 : f32 to vector<8x128xf32>
    %268 = arith.addf %265, %267 : vector<8x128xf32>
    %cst_36 = arith.constant 0.000000e+00 : f32
    %269 = vector.broadcast %cst_36 : f32 to vector<8x128xf32>
    %270 = arith.maximumf %268, %269 : vector<8x128xf32>
    %c3_37 = arith.constant 3 : index
    %271 = memref.load %arg6[%c3_37] : memref<10xf32, #tpu.memory_space<smem>>
    %272 = vector.broadcast %271 : f32 to vector<8x128xf32>
    %273 = arith.mulf %270, %272 : vector<8x128xf32>
    %274 = arith.addf %226, %273 : vector<8x128xf32>
    %c4_38 = arith.constant 4 : index
    %275 = memref.load %arg4[%c4_38] : memref<100xf32, #tpu.memory_space<smem>>
    %276 = vector.broadcast %275 : f32 to vector<8x128xf32>
    %277 = arith.mulf %8, %276 : vector<8x128xf32>
    %c14 = arith.constant 14 : index
    %278 = memref.load %arg4[%c14] : memref<100xf32, #tpu.memory_space<smem>>
    %279 = vector.broadcast %278 : f32 to vector<8x128xf32>
    %280 = arith.mulf %16, %279 : vector<8x128xf32>
    %281 = arith.addf %277, %280 : vector<8x128xf32>
    %c24 = arith.constant 24 : index
    %282 = memref.load %arg4[%c24] : memref<100xf32, #tpu.memory_space<smem>>
    %283 = vector.broadcast %282 : f32 to vector<8x128xf32>
    %284 = arith.mulf %24, %283 : vector<8x128xf32>
    %285 = arith.addf %281, %284 : vector<8x128xf32>
    %c34 = arith.constant 34 : index
    %286 = memref.load %arg4[%c34] : memref<100xf32, #tpu.memory_space<smem>>
    %287 = vector.broadcast %286 : f32 to vector<8x128xf32>
    %288 = arith.mulf %32, %287 : vector<8x128xf32>
    %289 = arith.addf %285, %288 : vector<8x128xf32>
    %c44 = arith.constant 44 : index
    %290 = memref.load %arg4[%c44] : memref<100xf32, #tpu.memory_space<smem>>
    %291 = vector.broadcast %290 : f32 to vector<8x128xf32>
    %292 = arith.mulf %40, %291 : vector<8x128xf32>
    %293 = arith.addf %289, %292 : vector<8x128xf32>
    %c54 = arith.constant 54 : index
    %294 = memref.load %arg4[%c54] : memref<100xf32, #tpu.memory_space<smem>>
    %295 = vector.broadcast %294 : f32 to vector<8x128xf32>
    %296 = arith.mulf %48, %295 : vector<8x128xf32>
    %297 = arith.addf %293, %296 : vector<8x128xf32>
    %c64 = arith.constant 64 : index
    %298 = memref.load %arg4[%c64] : memref<100xf32, #tpu.memory_space<smem>>
    %299 = vector.broadcast %298 : f32 to vector<8x128xf32>
    %300 = arith.mulf %56, %299 : vector<8x128xf32>
    %301 = arith.addf %297, %300 : vector<8x128xf32>
    %c74 = arith.constant 74 : index
    %302 = memref.load %arg4[%c74] : memref<100xf32, #tpu.memory_space<smem>>
    %303 = vector.broadcast %302 : f32 to vector<8x128xf32>
    %304 = arith.mulf %64, %303 : vector<8x128xf32>
    %305 = arith.addf %301, %304 : vector<8x128xf32>
    %c84 = arith.constant 84 : index
    %306 = memref.load %arg4[%c84] : memref<100xf32, #tpu.memory_space<smem>>
    %307 = vector.broadcast %306 : f32 to vector<8x128xf32>
    %308 = arith.mulf %72, %307 : vector<8x128xf32>
    %309 = arith.addf %305, %308 : vector<8x128xf32>
    %c94 = arith.constant 94 : index
    %310 = memref.load %arg4[%c94] : memref<100xf32, #tpu.memory_space<smem>>
    %311 = vector.broadcast %310 : f32 to vector<8x128xf32>
    %312 = arith.mulf %80, %311 : vector<8x128xf32>
    %313 = arith.addf %309, %312 : vector<8x128xf32>
    %c4_39 = arith.constant 4 : index
    %314 = memref.load %arg5[%c4_39] : memref<10xf32, #tpu.memory_space<smem>>
    %315 = vector.broadcast %314 : f32 to vector<8x128xf32>
    %316 = arith.addf %313, %315 : vector<8x128xf32>
    %cst_40 = arith.constant 0.000000e+00 : f32
    %317 = vector.broadcast %cst_40 : f32 to vector<8x128xf32>
    %318 = arith.maximumf %316, %317 : vector<8x128xf32>
    %c4_41 = arith.constant 4 : index
    %319 = memref.load %arg6[%c4_41] : memref<10xf32, #tpu.memory_space<smem>>
    %320 = vector.broadcast %319 : f32 to vector<8x128xf32>
    %321 = arith.mulf %318, %320 : vector<8x128xf32>
    %322 = arith.addf %274, %321 : vector<8x128xf32>
    %c5_42 = arith.constant 5 : index
    %323 = memref.load %arg4[%c5_42] : memref<100xf32, #tpu.memory_space<smem>>
    %324 = vector.broadcast %323 : f32 to vector<8x128xf32>
    %325 = arith.mulf %8, %324 : vector<8x128xf32>
    %c15 = arith.constant 15 : index
    %326 = memref.load %arg4[%c15] : memref<100xf32, #tpu.memory_space<smem>>
    %327 = vector.broadcast %326 : f32 to vector<8x128xf32>
    %328 = arith.mulf %16, %327 : vector<8x128xf32>
    %329 = arith.addf %325, %328 : vector<8x128xf32>
    %c25 = arith.constant 25 : index
    %330 = memref.load %arg4[%c25] : memref<100xf32, #tpu.memory_space<smem>>
    %331 = vector.broadcast %330 : f32 to vector<8x128xf32>
    %332 = arith.mulf %24, %331 : vector<8x128xf32>
    %333 = arith.addf %329, %332 : vector<8x128xf32>
    %c35 = arith.constant 35 : index
    %334 = memref.load %arg4[%c35] : memref<100xf32, #tpu.memory_space<smem>>
    %335 = vector.broadcast %334 : f32 to vector<8x128xf32>
    %336 = arith.mulf %32, %335 : vector<8x128xf32>
    %337 = arith.addf %333, %336 : vector<8x128xf32>
    %c45 = arith.constant 45 : index
    %338 = memref.load %arg4[%c45] : memref<100xf32, #tpu.memory_space<smem>>
    %339 = vector.broadcast %338 : f32 to vector<8x128xf32>
    %340 = arith.mulf %40, %339 : vector<8x128xf32>
    %341 = arith.addf %337, %340 : vector<8x128xf32>
    %c55 = arith.constant 55 : index
    %342 = memref.load %arg4[%c55] : memref<100xf32, #tpu.memory_space<smem>>
    %343 = vector.broadcast %342 : f32 to vector<8x128xf32>
    %344 = arith.mulf %48, %343 : vector<8x128xf32>
    %345 = arith.addf %341, %344 : vector<8x128xf32>
    %c65 = arith.constant 65 : index
    %346 = memref.load %arg4[%c65] : memref<100xf32, #tpu.memory_space<smem>>
    %347 = vector.broadcast %346 : f32 to vector<8x128xf32>
    %348 = arith.mulf %56, %347 : vector<8x128xf32>
    %349 = arith.addf %345, %348 : vector<8x128xf32>
    %c75 = arith.constant 75 : index
    %350 = memref.load %arg4[%c75] : memref<100xf32, #tpu.memory_space<smem>>
    %351 = vector.broadcast %350 : f32 to vector<8x128xf32>
    %352 = arith.mulf %64, %351 : vector<8x128xf32>
    %353 = arith.addf %349, %352 : vector<8x128xf32>
    %c85 = arith.constant 85 : index
    %354 = memref.load %arg4[%c85] : memref<100xf32, #tpu.memory_space<smem>>
    %355 = vector.broadcast %354 : f32 to vector<8x128xf32>
    %356 = arith.mulf %72, %355 : vector<8x128xf32>
    %357 = arith.addf %353, %356 : vector<8x128xf32>
    %c95 = arith.constant 95 : index
    %358 = memref.load %arg4[%c95] : memref<100xf32, #tpu.memory_space<smem>>
    %359 = vector.broadcast %358 : f32 to vector<8x128xf32>
    %360 = arith.mulf %80, %359 : vector<8x128xf32>
    %361 = arith.addf %357, %360 : vector<8x128xf32>
    %c5_43 = arith.constant 5 : index
    %362 = memref.load %arg5[%c5_43] : memref<10xf32, #tpu.memory_space<smem>>
    %363 = vector.broadcast %362 : f32 to vector<8x128xf32>
    %364 = arith.addf %361, %363 : vector<8x128xf32>
    %cst_44 = arith.constant 0.000000e+00 : f32
    %365 = vector.broadcast %cst_44 : f32 to vector<8x128xf32>
    %366 = arith.maximumf %364, %365 : vector<8x128xf32>
    %c5_45 = arith.constant 5 : index
    %367 = memref.load %arg6[%c5_45] : memref<10xf32, #tpu.memory_space<smem>>
    %368 = vector.broadcast %367 : f32 to vector<8x128xf32>
    %369 = arith.mulf %366, %368 : vector<8x128xf32>
    %370 = arith.addf %322, %369 : vector<8x128xf32>
    %c6_46 = arith.constant 6 : index
    %371 = memref.load %arg4[%c6_46] : memref<100xf32, #tpu.memory_space<smem>>
    %372 = vector.broadcast %371 : f32 to vector<8x128xf32>
    %373 = arith.mulf %8, %372 : vector<8x128xf32>
    %c16 = arith.constant 16 : index
    %374 = memref.load %arg4[%c16] : memref<100xf32, #tpu.memory_space<smem>>
    %375 = vector.broadcast %374 : f32 to vector<8x128xf32>
    %376 = arith.mulf %16, %375 : vector<8x128xf32>
    %377 = arith.addf %373, %376 : vector<8x128xf32>
    %c26 = arith.constant 26 : index
    %378 = memref.load %arg4[%c26] : memref<100xf32, #tpu.memory_space<smem>>
    %379 = vector.broadcast %378 : f32 to vector<8x128xf32>
    %380 = arith.mulf %24, %379 : vector<8x128xf32>
    %381 = arith.addf %377, %380 : vector<8x128xf32>
    %c36 = arith.constant 36 : index
    %382 = memref.load %arg4[%c36] : memref<100xf32, #tpu.memory_space<smem>>
    %383 = vector.broadcast %382 : f32 to vector<8x128xf32>
    %384 = arith.mulf %32, %383 : vector<8x128xf32>
    %385 = arith.addf %381, %384 : vector<8x128xf32>
    %c46 = arith.constant 46 : index
    %386 = memref.load %arg4[%c46] : memref<100xf32, #tpu.memory_space<smem>>
    %387 = vector.broadcast %386 : f32 to vector<8x128xf32>
    %388 = arith.mulf %40, %387 : vector<8x128xf32>
    %389 = arith.addf %385, %388 : vector<8x128xf32>
    %c56 = arith.constant 56 : index
    %390 = memref.load %arg4[%c56] : memref<100xf32, #tpu.memory_space<smem>>
    %391 = vector.broadcast %390 : f32 to vector<8x128xf32>
    %392 = arith.mulf %48, %391 : vector<8x128xf32>
    %393 = arith.addf %389, %392 : vector<8x128xf32>
    %c66 = arith.constant 66 : index
    %394 = memref.load %arg4[%c66] : memref<100xf32, #tpu.memory_space<smem>>
    %395 = vector.broadcast %394 : f32 to vector<8x128xf32>
    %396 = arith.mulf %56, %395 : vector<8x128xf32>
    %397 = arith.addf %393, %396 : vector<8x128xf32>
    %c76 = arith.constant 76 : index
    %398 = memref.load %arg4[%c76] : memref<100xf32, #tpu.memory_space<smem>>
    %399 = vector.broadcast %398 : f32 to vector<8x128xf32>
    %400 = arith.mulf %64, %399 : vector<8x128xf32>
    %401 = arith.addf %397, %400 : vector<8x128xf32>
    %c86 = arith.constant 86 : index
    %402 = memref.load %arg4[%c86] : memref<100xf32, #tpu.memory_space<smem>>
    %403 = vector.broadcast %402 : f32 to vector<8x128xf32>
    %404 = arith.mulf %72, %403 : vector<8x128xf32>
    %405 = arith.addf %401, %404 : vector<8x128xf32>
    %c96 = arith.constant 96 : index
    %406 = memref.load %arg4[%c96] : memref<100xf32, #tpu.memory_space<smem>>
    %407 = vector.broadcast %406 : f32 to vector<8x128xf32>
    %408 = arith.mulf %80, %407 : vector<8x128xf32>
    %409 = arith.addf %405, %408 : vector<8x128xf32>
    %c6_47 = arith.constant 6 : index
    %410 = memref.load %arg5[%c6_47] : memref<10xf32, #tpu.memory_space<smem>>
    %411 = vector.broadcast %410 : f32 to vector<8x128xf32>
    %412 = arith.addf %409, %411 : vector<8x128xf32>
    %cst_48 = arith.constant 0.000000e+00 : f32
    %413 = vector.broadcast %cst_48 : f32 to vector<8x128xf32>
    %414 = arith.maximumf %412, %413 : vector<8x128xf32>
    %c6_49 = arith.constant 6 : index
    %415 = memref.load %arg6[%c6_49] : memref<10xf32, #tpu.memory_space<smem>>
    %416 = vector.broadcast %415 : f32 to vector<8x128xf32>
    %417 = arith.mulf %414, %416 : vector<8x128xf32>
    %418 = arith.addf %370, %417 : vector<8x128xf32>
    %c7_50 = arith.constant 7 : index
    %419 = memref.load %arg4[%c7_50] : memref<100xf32, #tpu.memory_space<smem>>
    %420 = vector.broadcast %419 : f32 to vector<8x128xf32>
    %421 = arith.mulf %8, %420 : vector<8x128xf32>
    %c17 = arith.constant 17 : index
    %422 = memref.load %arg4[%c17] : memref<100xf32, #tpu.memory_space<smem>>
    %423 = vector.broadcast %422 : f32 to vector<8x128xf32>
    %424 = arith.mulf %16, %423 : vector<8x128xf32>
    %425 = arith.addf %421, %424 : vector<8x128xf32>
    %c27 = arith.constant 27 : index
    %426 = memref.load %arg4[%c27] : memref<100xf32, #tpu.memory_space<smem>>
    %427 = vector.broadcast %426 : f32 to vector<8x128xf32>
    %428 = arith.mulf %24, %427 : vector<8x128xf32>
    %429 = arith.addf %425, %428 : vector<8x128xf32>
    %c37 = arith.constant 37 : index
    %430 = memref.load %arg4[%c37] : memref<100xf32, #tpu.memory_space<smem>>
    %431 = vector.broadcast %430 : f32 to vector<8x128xf32>
    %432 = arith.mulf %32, %431 : vector<8x128xf32>
    %433 = arith.addf %429, %432 : vector<8x128xf32>
    %c47 = arith.constant 47 : index
    %434 = memref.load %arg4[%c47] : memref<100xf32, #tpu.memory_space<smem>>
    %435 = vector.broadcast %434 : f32 to vector<8x128xf32>
    %436 = arith.mulf %40, %435 : vector<8x128xf32>
    %437 = arith.addf %433, %436 : vector<8x128xf32>
    %c57 = arith.constant 57 : index
    %438 = memref.load %arg4[%c57] : memref<100xf32, #tpu.memory_space<smem>>
    %439 = vector.broadcast %438 : f32 to vector<8x128xf32>
    %440 = arith.mulf %48, %439 : vector<8x128xf32>
    %441 = arith.addf %437, %440 : vector<8x128xf32>
    %c67 = arith.constant 67 : index
    %442 = memref.load %arg4[%c67] : memref<100xf32, #tpu.memory_space<smem>>
    %443 = vector.broadcast %442 : f32 to vector<8x128xf32>
    %444 = arith.mulf %56, %443 : vector<8x128xf32>
    %445 = arith.addf %441, %444 : vector<8x128xf32>
    %c77 = arith.constant 77 : index
    %446 = memref.load %arg4[%c77] : memref<100xf32, #tpu.memory_space<smem>>
    %447 = vector.broadcast %446 : f32 to vector<8x128xf32>
    %448 = arith.mulf %64, %447 : vector<8x128xf32>
    %449 = arith.addf %445, %448 : vector<8x128xf32>
    %c87 = arith.constant 87 : index
    %450 = memref.load %arg4[%c87] : memref<100xf32, #tpu.memory_space<smem>>
    %451 = vector.broadcast %450 : f32 to vector<8x128xf32>
    %452 = arith.mulf %72, %451 : vector<8x128xf32>
    %453 = arith.addf %449, %452 : vector<8x128xf32>
    %c97 = arith.constant 97 : index
    %454 = memref.load %arg4[%c97] : memref<100xf32, #tpu.memory_space<smem>>
    %455 = vector.broadcast %454 : f32 to vector<8x128xf32>
    %456 = arith.mulf %80, %455 : vector<8x128xf32>
    %457 = arith.addf %453, %456 : vector<8x128xf32>
    %c7_51 = arith.constant 7 : index
    %458 = memref.load %arg5[%c7_51] : memref<10xf32, #tpu.memory_space<smem>>
    %459 = vector.broadcast %458 : f32 to vector<8x128xf32>
    %460 = arith.addf %457, %459 : vector<8x128xf32>
    %cst_52 = arith.constant 0.000000e+00 : f32
    %461 = vector.broadcast %cst_52 : f32 to vector<8x128xf32>
    %462 = arith.maximumf %460, %461 : vector<8x128xf32>
    %c7_53 = arith.constant 7 : index
    %463 = memref.load %arg6[%c7_53] : memref<10xf32, #tpu.memory_space<smem>>
    %464 = vector.broadcast %463 : f32 to vector<8x128xf32>
    %465 = arith.mulf %462, %464 : vector<8x128xf32>
    %466 = arith.addf %418, %465 : vector<8x128xf32>
    %c8_54 = arith.constant 8 : index
    %467 = memref.load %arg4[%c8_54] : memref<100xf32, #tpu.memory_space<smem>>
    %468 = vector.broadcast %467 : f32 to vector<8x128xf32>
    %469 = arith.mulf %8, %468 : vector<8x128xf32>
    %c18 = arith.constant 18 : index
    %470 = memref.load %arg4[%c18] : memref<100xf32, #tpu.memory_space<smem>>
    %471 = vector.broadcast %470 : f32 to vector<8x128xf32>
    %472 = arith.mulf %16, %471 : vector<8x128xf32>
    %473 = arith.addf %469, %472 : vector<8x128xf32>
    %c28 = arith.constant 28 : index
    %474 = memref.load %arg4[%c28] : memref<100xf32, #tpu.memory_space<smem>>
    %475 = vector.broadcast %474 : f32 to vector<8x128xf32>
    %476 = arith.mulf %24, %475 : vector<8x128xf32>
    %477 = arith.addf %473, %476 : vector<8x128xf32>
    %c38 = arith.constant 38 : index
    %478 = memref.load %arg4[%c38] : memref<100xf32, #tpu.memory_space<smem>>
    %479 = vector.broadcast %478 : f32 to vector<8x128xf32>
    %480 = arith.mulf %32, %479 : vector<8x128xf32>
    %481 = arith.addf %477, %480 : vector<8x128xf32>
    %c48 = arith.constant 48 : index
    %482 = memref.load %arg4[%c48] : memref<100xf32, #tpu.memory_space<smem>>
    %483 = vector.broadcast %482 : f32 to vector<8x128xf32>
    %484 = arith.mulf %40, %483 : vector<8x128xf32>
    %485 = arith.addf %481, %484 : vector<8x128xf32>
    %c58 = arith.constant 58 : index
    %486 = memref.load %arg4[%c58] : memref<100xf32, #tpu.memory_space<smem>>
    %487 = vector.broadcast %486 : f32 to vector<8x128xf32>
    %488 = arith.mulf %48, %487 : vector<8x128xf32>
    %489 = arith.addf %485, %488 : vector<8x128xf32>
    %c68 = arith.constant 68 : index
    %490 = memref.load %arg4[%c68] : memref<100xf32, #tpu.memory_space<smem>>
    %491 = vector.broadcast %490 : f32 to vector<8x128xf32>
    %492 = arith.mulf %56, %491 : vector<8x128xf32>
    %493 = arith.addf %489, %492 : vector<8x128xf32>
    %c78 = arith.constant 78 : index
    %494 = memref.load %arg4[%c78] : memref<100xf32, #tpu.memory_space<smem>>
    %495 = vector.broadcast %494 : f32 to vector<8x128xf32>
    %496 = arith.mulf %64, %495 : vector<8x128xf32>
    %497 = arith.addf %493, %496 : vector<8x128xf32>
    %c88 = arith.constant 88 : index
    %498 = memref.load %arg4[%c88] : memref<100xf32, #tpu.memory_space<smem>>
    %499 = vector.broadcast %498 : f32 to vector<8x128xf32>
    %500 = arith.mulf %72, %499 : vector<8x128xf32>
    %501 = arith.addf %497, %500 : vector<8x128xf32>
    %c98 = arith.constant 98 : index
    %502 = memref.load %arg4[%c98] : memref<100xf32, #tpu.memory_space<smem>>
    %503 = vector.broadcast %502 : f32 to vector<8x128xf32>
    %504 = arith.mulf %80, %503 : vector<8x128xf32>
    %505 = arith.addf %501, %504 : vector<8x128xf32>
    %c8_55 = arith.constant 8 : index
    %506 = memref.load %arg5[%c8_55] : memref<10xf32, #tpu.memory_space<smem>>
    %507 = vector.broadcast %506 : f32 to vector<8x128xf32>
    %508 = arith.addf %505, %507 : vector<8x128xf32>
    %cst_56 = arith.constant 0.000000e+00 : f32
    %509 = vector.broadcast %cst_56 : f32 to vector<8x128xf32>
    %510 = arith.maximumf %508, %509 : vector<8x128xf32>
    %c8_57 = arith.constant 8 : index
    %511 = memref.load %arg6[%c8_57] : memref<10xf32, #tpu.memory_space<smem>>
    %512 = vector.broadcast %511 : f32 to vector<8x128xf32>
    %513 = arith.mulf %510, %512 : vector<8x128xf32>
    %514 = arith.addf %466, %513 : vector<8x128xf32>
    %c9_58 = arith.constant 9 : index
    %515 = memref.load %arg4[%c9_58] : memref<100xf32, #tpu.memory_space<smem>>
    %516 = vector.broadcast %515 : f32 to vector<8x128xf32>
    %517 = arith.mulf %8, %516 : vector<8x128xf32>
    %c19 = arith.constant 19 : index
    %518 = memref.load %arg4[%c19] : memref<100xf32, #tpu.memory_space<smem>>
    %519 = vector.broadcast %518 : f32 to vector<8x128xf32>
    %520 = arith.mulf %16, %519 : vector<8x128xf32>
    %521 = arith.addf %517, %520 : vector<8x128xf32>
    %c29 = arith.constant 29 : index
    %522 = memref.load %arg4[%c29] : memref<100xf32, #tpu.memory_space<smem>>
    %523 = vector.broadcast %522 : f32 to vector<8x128xf32>
    %524 = arith.mulf %24, %523 : vector<8x128xf32>
    %525 = arith.addf %521, %524 : vector<8x128xf32>
    %c39 = arith.constant 39 : index
    %526 = memref.load %arg4[%c39] : memref<100xf32, #tpu.memory_space<smem>>
    %527 = vector.broadcast %526 : f32 to vector<8x128xf32>
    %528 = arith.mulf %32, %527 : vector<8x128xf32>
    %529 = arith.addf %525, %528 : vector<8x128xf32>
    %c49 = arith.constant 49 : index
    %530 = memref.load %arg4[%c49] : memref<100xf32, #tpu.memory_space<smem>>
    %531 = vector.broadcast %530 : f32 to vector<8x128xf32>
    %532 = arith.mulf %40, %531 : vector<8x128xf32>
    %533 = arith.addf %529, %532 : vector<8x128xf32>
    %c59 = arith.constant 59 : index
    %534 = memref.load %arg4[%c59] : memref<100xf32, #tpu.memory_space<smem>>
    %535 = vector.broadcast %534 : f32 to vector<8x128xf32>
    %536 = arith.mulf %48, %535 : vector<8x128xf32>
    %537 = arith.addf %533, %536 : vector<8x128xf32>
    %c69 = arith.constant 69 : index
    %538 = memref.load %arg4[%c69] : memref<100xf32, #tpu.memory_space<smem>>
    %539 = vector.broadcast %538 : f32 to vector<8x128xf32>
    %540 = arith.mulf %56, %539 : vector<8x128xf32>
    %541 = arith.addf %537, %540 : vector<8x128xf32>
    %c79 = arith.constant 79 : index
    %542 = memref.load %arg4[%c79] : memref<100xf32, #tpu.memory_space<smem>>
    %543 = vector.broadcast %542 : f32 to vector<8x128xf32>
    %544 = arith.mulf %64, %543 : vector<8x128xf32>
    %545 = arith.addf %541, %544 : vector<8x128xf32>
    %c89 = arith.constant 89 : index
    %546 = memref.load %arg4[%c89] : memref<100xf32, #tpu.memory_space<smem>>
    %547 = vector.broadcast %546 : f32 to vector<8x128xf32>
    %548 = arith.mulf %72, %547 : vector<8x128xf32>
    %549 = arith.addf %545, %548 : vector<8x128xf32>
    %c99 = arith.constant 99 : index
    %550 = memref.load %arg4[%c99] : memref<100xf32, #tpu.memory_space<smem>>
    %551 = vector.broadcast %550 : f32 to vector<8x128xf32>
    %552 = arith.mulf %80, %551 : vector<8x128xf32>
    %553 = arith.addf %549, %552 : vector<8x128xf32>
    %c9_59 = arith.constant 9 : index
    %554 = memref.load %arg5[%c9_59] : memref<10xf32, #tpu.memory_space<smem>>
    %555 = vector.broadcast %554 : f32 to vector<8x128xf32>
    %556 = arith.addf %553, %555 : vector<8x128xf32>
    %cst_60 = arith.constant 0.000000e+00 : f32
    %557 = vector.broadcast %cst_60 : f32 to vector<8x128xf32>
    %558 = arith.maximumf %556, %557 : vector<8x128xf32>
    %c9_61 = arith.constant 9 : index
    %559 = memref.load %arg6[%c9_61] : memref<10xf32, #tpu.memory_space<smem>>
    %560 = vector.broadcast %559 : f32 to vector<8x128xf32>
    %561 = arith.mulf %558, %560 : vector<8x128xf32>
    %562 = arith.addf %514, %561 : vector<8x128xf32>
    %c0_62 = arith.constant 0 : index
    %c0_63 = arith.constant 0 : index
    %563 = vector.load %arg8[%c0_62, %c0_63] : memref<8x128xf32, #tpu.memory_space<vmem>>, vector<8x128xf32>
    tpu.vector_store %arg8[%c0_62, %c0_63], %562 {strides = array<i32>} : memref<8x128xf32, #tpu.memory_space<vmem>>, vector<8x128xf32>,
    return
  }
  func.func @transform_0(%arg0: i32) -> (i32, i32) {
    %c0_i32 = arith.constant 0 : i32
    %c0_i32_0 = arith.constant 0 : i32
    return %arg0, %c0_i32 : i32, i32
  }
  func.func @transform_1(%arg0: i32) -> i32 {
    %c0_i32 = arith.constant 0 : i32
    %c0_i32_0 = arith.constant 0 : i32
    return %c0_i32 : i32
  }
  func.func @transform_2(%arg0: i32) -> i32 {
    %c0_i32 = arith.constant 0 : i32
    %c0_i32_0 = arith.constant 0 : i32
    return %c0_i32 : i32
  }
  func.func @transform_3(%arg0: i32) -> i32 {
    %c0_i32 = arith.constant 0 : i32
    %c0_i32_0 = arith.constant 0 : i32
    return %c0_i32 : i32
  }
  func.func @transform_4(%arg0: i32) -> i32 {
    %c0_i32 = arith.constant 0 : i32
    %c0_i32_0 = arith.constant 0 : i32
    return %c0_i32 : i32
  }
  func.func @transform_5(%arg0: i32) -> i32 {
    %c0_i32 = arith.constant 0 : i32
    %c0_i32_0 = arith.constant 0 : i32
    return %c0_i32 : i32
  }
  func.func @transform_6(%arg0: i32) -> i32 {
    %c0_i32 = arith.constant 0 : i32
    %c0_i32_0 = arith.constant 0 : i32
    return %c0_i32 : i32
  }
  func.func @transform_7(%arg0: i32) -> (i32, i32) {
    %c0_i32 = arith.constant 0 : i32
    %c0_i32_0 = arith.constant 0 : i32
    return %arg0, %c0_i32 : i32, i32
  }
}

</mosaic_0001>

<bundles_post_ra>
// kernel: tpu_custom_call.1
= control target key start
LH: loop header
LB: loop body
LE: loop exit
PB: predicated region body
PF: predicated region fallthrough
CT: control target
= control target key end

     0   :  { %s1527_s0 = inlined_call_operand.hbm [shape: f32[8,128], index: 0, kind: input, shape index: {}]   ;;  %s1528_s1 = inlined_call_operand.vmem [shape: f32[10], index: 1, kind: input, shape index: {}]   ;;  %s1529_s2 = inlined_call_operand.vmem [shape: f32[10], index: 2, kind: input, shape index: {}]   ;;  %s1530_s3 = inlined_call_operand.vmem [shape: f32[100], index: 3, kind: input, shape index: {}]   ;;  %s1531_s4 = inlined_call_operand.vmem [shape: f32[10], index: 4, kind: input, shape index: {}]   ;;  %s1532_s5 = inlined_call_operand.vmem [shape: f32[10], index: 5, kind: input, shape index: {}]   ;;  %s1533_s6 = inlined_call_operand.<no memory space> [shape: f32[1], index: 6, kind: input, shape index: {}]   ;;  %s1534_s7 = inlined_call_operand.hbm [shape: f32[8,128], index: 7, kind: output, shape index: {}]  }
   0x1   :  { %1535 = sst [smem:[#allocation23_spill]] %s1533_s6 }
   0x2   :  { %1536 = sst [smem:[#allocation24_spill]] %s1534_s7 }
   0x3   :  { %13 = vsyncpa [#allocation4], 0 }
   0x4   :  { %14 = vsyncpa [#allocation6], 0 }
   0x5   :  { %15 = vsyncpa [#allocation9], 0 }
   0x6   :  { %16 = vsyncpa [#allocation12], 0  ;;  %s44_s26 = sshll.u32 %s1529_s2, 4  ;;  %s45_s26 = int_to_ptr.vmem [resolvable:$true] %s44_s26 }
   0x7   :  { %17 = vsyncpa [#allocation5], 0  ;;  %s64_s29 = sshll.u32 %s1531_s4, 4  ;;  %s803_s30 = scalar_lea.vmem %s45_s26, 16  ;;  %s65_s29 = int_to_ptr.vmem [resolvable:$true] %s64_s29 }
   0x8   :  { %p804_p0 = scmp.ne.s32.totalorder %s45_s26, %s803_s30  ;;  %p808_p1 = scmp.lt.s32.totalorder %s45_s26, %s45_s26 }
   0x9   :  { %p809_p2 = scmp.lt.s32.totalorder %s803_s30, %s803_s30 }
   0xb   :  { %p810_p3 = por %p809_p2, %p808_p1 }
   0xd   :  { %p811_p4 = pnand %p810_p3, %p804_p0 }
   0xf   :  { %814 = shalt.err (!%p811_p4)
}
  0x10   :  { %s913_s8 = smov [#allocation8]   ;;  %s815_s9 = scalar_lea.vmem %s65_s29, 16 }
  0x11   :  { %47 = dma.vmem_to_smem %s45_s26, 16, %s913_s8, [#allocation9]  }
  0x12   :  { %p816_p5 = scmp.ne.s32.totalorder %s65_s29, %s815_s9  ;;  %p820_p6 = scmp.lt.s32.totalorder %s65_s29, %s65_s29 }
  0x13   :  { %p821_p7 = scmp.lt.s32.totalorder %s815_s9, %s815_s9 }
  0x15   :  { %p822_p8 = por %p821_p7, %p820_p6 }
  0x17   :  { %p823_p9 = pnand %p822_p8, %p816_p5 }
  0x19   :  { %826 = shalt.err (!%p823_p9)
}
  0x1a   :  { %s914_s2 = smov [#allocation11]   ;;  %s34_s11 = sshll.u32 %s1528_s1, 4  ;;  %s35_s11 = int_to_ptr.vmem [resolvable:$true] %s34_s11 }
  0x1b   :  { %67 = dma.vmem_to_smem %s65_s29, 16, %s914_s2, [#allocation12]  }
  0x1c   :  { %s915_s12 = smov [#allocation3]  }
  0x1d   :  { %s24_s13 = sshll.u32 %s915_s12, 4  ;;  %s25_s13 = int_to_ptr.vmem [resolvable:$true] %s24_s13 }
  0x1e   :  { %s835_s14 = scalar_lea.vmem %s25_s13, 128  ;;  %p840_p11 = scmp.lt.s32.totalorder %s25_s13, %s25_s13 }
  0x1f   :  { %p836_p10 = scmp.ne.s32.totalorder %s25_s13, %s835_s14  ;;  %p841_p12 = scmp.lt.s32.totalorder %s835_s14, %s835_s14 }
  0x21   :  { %p842_p13 = por %p841_p12, %p840_p11 }
  0x23   :  { %p843_p0 = pnand %p842_p13, %p836_p10 }
  0x25   :  { %846 = shalt.err (!%p843_p0)
}
  0x26   :  { %27 = dma.hbm_to_vmem [thread:$0]  %s1527_s0, 128, %s25_s13, [#allocation4]  }
  0x27   :  { %s847_s17 = scalar_lea.vmem %s35_s11, 16  ;;  %p852_p2 = scmp.lt.s32.totalorder %s35_s11, %s35_s11 }
  0x28   :  { %p848_p1 = scmp.ne.s32.totalorder %s35_s11, %s847_s17  ;;  %p853_p3 = scmp.lt.s32.totalorder %s847_s17, %s847_s17 }
  0x2a   :  { %p854_p4 = por %p853_p3, %p852_p2 }
  0x2c   :  { %p855_p5 = pnand %p854_p4, %p848_p1 }
  0x2e   :  { %858 = shalt.err (!%p855_p5)
}
  0x2f   :  { %s916_s1 = smov [#allocation7]   ;;  %s54_s20 = sshll.u32 %s1530_s3, 4  ;;  %s55_s20 = int_to_ptr.vmem [resolvable:$true] %s54_s20 }
  0x30   :  { %37 = dma.vmem_to_smem %s35_s11, 16, %s916_s1, [#allocation6]  }
  0x31   :  { %s74_s23 = sshll.u32 %s1532_s5, 4  ;;  %s859_s24 = scalar_lea.vmem %s55_s20, 16  ;;  %s75_s23 = int_to_ptr.vmem [resolvable:$true] %s74_s23 }
  0x32   :  { %p860_p6 = scmp.ne.s32.totalorder %s55_s20, %s859_s24  ;;  %p864_p7 = scmp.lt.s32.totalorder %s55_s20, %s55_s20 }
  0x33   :  { %p865_p8 = scmp.lt.s32.totalorder %s859_s24, %s859_s24 }
  0x35   :  { %p866_p9 = por %p865_p8, %p864_p7 }
  0x37   :  { %p867_p10 = pnand %p866_p9, %p860_p6 }
  0x39   :  { %870 = shalt.err (!%p867_p10)
}
  0x3a   :  { %s917_s0 = smov [#allocation10]   ;;  %s871_s25 = scalar_lea.vmem %s75_s23, 16 }
  0x3b   :  { %57 = dma.vmem_to_smem %s55_s20, 16, %s917_s0, [#allocation9]  }
  0x3c   :  { %p872_p11 = scmp.ne.s32.totalorder %s75_s23, %s871_s25  ;;  %p876_p12 = scmp.lt.s32.totalorder %s75_s23, %s75_s23 }
  0x3d   :  { %p877_p13 = scmp.lt.s32.totalorder %s871_s25, %s871_s25 }
  0x3f   :  { %p878_p0 = por %p877_p13, %p876_p12 }
  0x41   :  { %p879_p1 = pnand %p878_p0, %p872_p11 }
  0x43   :  { %882 = shalt.err (!%p879_p1)
}
  0x44   :  { %s918_s3 = smov [#allocation13]  }
  0x45   :  { %77 = dma.vmem_to_smem %s75_s23, 16, %s918_s3, [#allocation12]  }
  0x46   :  { %903 = dma.done.wait [#allocation4], 128  }
  0x47   :  { %904 = vsyncadd [#allocation4], 4294967168 }
  0x48   :  { %905 = dma.done.wait [#allocation6], 16  }
  0x49   :  { %906 = vsyncadd [#allocation6], 4294967280 }
  0x4a   :  { %907 = dma.done.wait [#allocation9], 32  }
  0x4b   :  { %908 = vsyncadd [#allocation9], 4294967264 }
  0x4c   :  { %909 = dma.done.wait [#allocation12], 32  }
  0x4d   :  { %910 = vsyncadd [#allocation12], 4294967264 }
  0x4e   :  { %98 = sfence }
  0x4f   :  { %s978_s5 = sld [smem:[#allocation7]]  ;;  %v1030_v0 = vld [vmem:[#allocation3] sm:$0xff] }
  0x50   :  { %s980_s26 = sld [smem:[#allocation8]] }
  0x51   :  { %s982_s27 = sld [smem:[#allocation7 + $0x1]] }
  0x52   :  { %s984_s28 = sld [smem:[#allocation8 + $0x1]] }
  0x53   :  { %s986_s29 = sld [smem:[#allocation7 + $0x2]] }
  0x54   :  { %s988_s30 = sld [smem:[#allocation8 + $0x2]] }
  0x55   :  { %s990_s8 = sld [smem:[#allocation7 + $0x3]]  ;;  %v101_v1 = vstv %s978_s5 }
  0x56   :  { %s992_s9 = sld [smem:[#allocation8 + $0x3]]  ;;  %v102_v3 = vmul.f32 %v101_v1, %v1030_v0  ;;  %v104_v5 = vstv %s980_s26 }
  0x57   :  { %s994_s2 = sld [smem:[#allocation7 + $0x4]]  ;;  %v108_v2 = vstv %s982_s27 }
  0x58   :  { %s996_s4 = sld [smem:[#allocation8 + $0x4]]  ;;  %v109_v4 = vmul.f32 %v108_v2, %v1030_v0  ;;  %v111_v6 = vstv %s984_s28  ;;  %v105_v8 = vadd.f32 %v104_v5, %v102_v3 }
  0x59   :  { %s998_s10 = sld [smem:[#allocation7 + $0x5]]  ;;  %v115_v7 = vstv %s986_s29 }
  0x5a   :  { %s1000_s11 = sld [smem:[#allocation8 + $0x5]]  ;;  %v112_v9 = vadd.f32 %v111_v6, %v109_v4  ;;  %v116_v10 = vmul.f32 %v115_v7, %v1030_v0  ;;  %v118_v12 = vstv %s988_s30  ;;  %v1066_v15 = vmax.f32 %v105_v8, 0.0 }
  0x5b   :  { %s1002_s12 = sld [smem:[#allocation7 + $0x6]]  ;;  %v122_v11 = vstv %s990_s8 }
  0x5c   :  { %s1004_s13 = sld [smem:[#allocation8 + $0x6]]  ;;  %v123_v13 = vmul.f32 %v122_v11, %v1030_v0  ;;  %v1068_v16 = vmax.f32 %v112_v9, 0.0  ;;  %v119_v17 = vadd.f32 %v118_v12, %v116_v10  ;;  %v125_v18 = vstv %s992_s9 }
  0x5d   :  { %s1006_s14 = sld [smem:[#allocation7 + $0x7]]  ;;  %v129_v14 = vstv %s994_s2 }
  0x5e   :  { %s1008_s15 = sld [smem:[#allocation8 + $0x7]]  ;;  %v130_v21 = vmul.f32 %v129_v14, %v1030_v0  ;;  %v126_v22 = vadd.f32 %v125_v18, %v123_v13  ;;  %v132_v23 = vstv %s996_s4  ;;  %v1083_v24 = vmax.f32 %v119_v17, 0.0 }
  0x5f   :  { %s1010_s16 = sld [smem:[#allocation7 + $0x8]]  ;;  %v136_v25 = vstv %s998_s10 }
  0x60   :  { %s1012_s17 = sld [smem:[#allocation8 + $0x8]]  ;;  %v133_v29 = vadd.f32 %v132_v23, %v130_v21  ;;  %v1095_v30 = vmax.f32 %v126_v22, 0.0  ;;  %v137_v31 = vmul.f32 %v136_v25, %v1030_v0  ;;  %v139_v32 = vstv %s1000_s11 }
  0x61   :  { %s1014_s1 = sld [smem:[#allocation7 + $0x9]]  ;;  %v143_v33 = vstv %s1002_s12 }
  0x62   :  { %s1016_s18 = sld [smem:[#allocation8 + $0x9]]  ;;  %v1108_v37 = vmax.f32 %v133_v29, 0.0  ;;  %v140_v38 = vadd.f32 %v139_v32, %v137_v31  ;;  %v144_v39 = vmul.f32 %v143_v33, %v1030_v0  ;;  %v146_v42 = vstv %s1004_s13 }
  0x63   :  { %s1018_s19 = sld [smem:[#allocation10]]  ;;  %v150_v43 = vstv %s1006_s14 }
  0x64   :  { %s1020_s20 = sld [smem:[#allocation10 + $0xa]]  ;;  %v147_v49 = vadd.f32 %v146_v42, %v144_v39  ;;  %v151_v50 = vmul.f32 %v150_v43, %v1030_v0  ;;  %v1133_v52 = vmax.f32 %v140_v38, 0.0  ;;  %v153_v53 = vstv %s1008_s15 }
  0x65   :  { %s1022_s21 = sld [smem:[#allocation10 + $0x14]]  ;;  %v157_v56 = vstv %s1010_s16 }
  0x66   :  { %s1024_s22 = sld [smem:[#allocation10 + $0x1e]]  ;;  %v1146_v60 = vmax.f32 %v147_v49, 0.0  ;;  %v154_v61 = vadd.f32 %v153_v53, %v151_v50  ;;  %v158_v63 = vmul.f32 %v157_v56, %v1030_v0  ;;  %v160_v4 = vstv %s1012_s17 }
  0x67   :  { %s1026_s23 = sld [smem:[#allocation10 + $0x28]]  ;;  %v164_v1 = vstv %s1014_s1 }
  0x68   :  { %s1028_s24 = sld [smem:[#allocation10 + $0x32]]  ;;  %v1165_v10 = vmax.f32 %v154_v61, 0.0  ;;  %v165_v11 = vmul.f32 %v164_v1, %v1030_v0  ;;  %v161_v13 = vadd.f32 %v160_v4, %v158_v63  ;;  %v167_v14 = vstv %s1016_s18 }
  0x69   :  { %s1034_s0 = sld [smem:[#allocation10 + $0x3c]]  ;;  %v173_v19 = vstv %s1018_s19 }
  0x6a   :  { %s1036_s25 = sld [smem:[#allocation10 + $0x46]]  ;;  %v176_v20 = vstv %s1020_s20  ;;  %v174_v26 = vmul.f32 %v173_v19, %v1066_v15  ;;  %v168_v25 = vadd.f32 %v167_v14, %v165_v11 }
  0x6b   :  { %s1038_s3 = sld [smem:[#allocation10 + $0x50]]  ;;  %v177_v27 = vmul.f32 %v176_v20, %v1068_v16  ;;  %v180_v28 = vstv %s1022_s21 }
  0x6c   :  { %s1042_s7 = sld [smem:[#allocation10 + $0x5a]]  ;;  %v181_v35 = vmul.f32 %v180_v28, %v1083_v24  ;;  %v184_v36 = vstv %s1024_s22  ;;  %v1200_v38 = vmax.f32 %v168_v25, 0.0 }
  0x6d   :  { %s1047_s5 = sld [smem:[#allocation11]]  ;;  %v178_v34 = vadd.f32 %v177_v27, %v174_v26  ;;  %v185_v45 = vmul.f32 %v184_v36, %v1095_v30  ;;  %v188_v46 = vstv %s1026_s23  ;;  %v1187_v27 = vmax.f32 %v161_v13, 0.0 }
  0x6e   :  { %s1049_s27 = sld [smem:[#allocation13]]  ;;  %v189_v55 = vmul.f32 %v188_v46, %v1108_v37  ;;  %v192_v57 = vstv %s1028_s24 }
  0x6f   :  { %s1051_s6 = sld [smem:[#allocation10 + $0x1]]  ;;  %v182_v44 = vadd.f32 %v181_v35, %v178_v34  ;;  %v193_v3 = vmul.f32 %v192_v57, %v1133_v52  ;;  %v196_v5 = vstv %s1034_s0 }
  0x70   :  { %s1058_s26 = sld [smem:[#allocation10 + $0x15]]  ;;  %v197_v18 = vmul.f32 %v196_v5, %v1146_v60  ;;  %v200_v19 = vstv %s1036_s25 }
  0x71   :  { %1537 = sst [smem:[#allocation20_spill]] %s1038_s3  ;;  %v186_v54 = vadd.f32 %v185_v45, %v182_v44  ;;  %v201_v29 = vmul.f32 %v200_v19, %v1165_v10 }
  0x72   :  { %s1055_s3 = sld [smem:[#allocation10 + $0xb]]  ;;  %v208_v44 = vstv %s1042_s7 }
  0x73   :  { %s1060_s28 = sld [smem:[#allocation10 + $0x1f]]  ;;  %v190_v2 = vadd.f32 %v189_v55, %v186_v54  ;;  %v209_v55 = vmul.f32 %v208_v44, %v1200_v38 }
  0x74   :  { %1538 = sst [smem:[#allocation21_spill]] %s1049_s27 }
  0x75   :  { %s1064_s29 = sld [smem:[#allocation10 + $0x29]]  ;;  %v220_v40 = vstv %s1051_s6  ;;  %v194_v17 = vadd.f32 %v193_v3, %v190_v2 }
  0x76   :  { %s1071_s8 = sld [smem:[#allocation10 + $0x33]]  ;;  %v221_v47 = vmul.f32 %v220_v40, %v1066_v15  ;;  %v227_v51 = vstv %s1058_s26 }
  0x77   :  { %s1075_s30 = sld [smem:[#allocation10 + $0x3d]]  ;;  %v228_v59 = vmul.f32 %v227_v51, %v1083_v24  ;;  %v198_v28 = vadd.f32 %v197_v18, %v194_v17 }
  0x78   :  { %s1078_s27 = sld [smem:[#allocation10 + $0x47]]  ;;  %v223_v41 = vstv %s1055_s3 }
  0x79   :  { %s1081_s2 = sld [smem:[#allocation10 + $0x51]]  ;;  %v224_v48 = vmul.f32 %v223_v41, %v1068_v16  ;;  %v231_v62 = vstv %s1060_s28  ;;  %v202_v40 = vadd.f32 %v201_v29, %v198_v28 }
  0x7a   :  { %s1088_s9 = sld [smem:[#allocation10 + $0x5b]]  ;;  %v232_v7 = vmul.f32 %v231_v62, %v1095_v30 }
  0x7b   :  { %s1091_s19 = sld [smem:[#allocation11 + $0x1]]  ;;  %v225_v58 = vadd.f32 %v224_v48, %v221_v47  ;;  %v235_v12 = vstv %s1064_s29 }
  0x7c   :  { %s1093_s20 = sld [smem:[#allocation13 + $0x1]]  ;;  %v236_v22 = vmul.f32 %v235_v12, %v1108_v37  ;;  %v239_v26 = vstv %s1071_s8 }
  0x7d   :  { %s1098_s4 = sld [smem:[#allocation10 + $0x2]]  ;;  %v229_v6 = vadd.f32 %v228_v59, %v225_v58  ;;  %v240_v35 = vmul.f32 %v239_v26, %v1133_v52  ;;  %v243_v39 = vstv %s1075_s30 }
  0x7e   :  { %s1103_s10 = sld [smem:[#allocation10 + $0xc]]  ;;  %v244_v48 = vmul.f32 %v243_v39, %v1146_v60  ;;  %v247_v50 = vstv %s1078_s27 }
  0x7f   :  { %s1106_s21 = sld [smem:[#allocation10 + $0x16]]  ;;  %v233_v0 = vadd.f32 %v232_v7, %v229_v6  ;;  %v248_v61 = vmul.f32 %v247_v50, %v1165_v10  ;;  %v251_v62 = vstv %s1081_s2  ;;  %v212_v6 = vstv %s1047_s5 }
  0x80   :  { %s1115_s11 = sld [smem:[#allocation10 + $0x2a]] }
  0x81   :  { %s1120_s12 = sld [smem:[#allocation10 + $0x34]]  ;;  %v237_v34 = vadd.f32 %v236_v22, %v233_v0 }
  0x82   :  { %1539 = sst [smem:[#allocation22_spill]] %s1093_s20 }
  0x83   :  { %s1110_s20 = sld [smem:[#allocation10 + $0x20]]  ;;  %v267_v8 = vstv %s1098_s4  ;;  %v241_v47 = vadd.f32 %v240_v35, %v237_v34 }
  0x84   :  { %s1123_s22 = sld [smem:[#allocation10 + $0x3e]]  ;;  %v270_v9 = vstv %s1103_s10  ;;  %v268_v20 = vmul.f32 %v267_v8, %v1066_v15  ;;  %v252_v8 = vmul.f32 %v251_v62, %v1187_v27 }
  0x85   :  { %s1127_s6 = sld [smem:[#allocation10 + $0x48]]  ;;  %v271_v21 = vmul.f32 %v270_v9, %v1068_v16  ;;  %v274_v23 = vstv %s1106_s21  ;;  %v245_v59 = vadd.f32 %v244_v48, %v241_v47  ;;  %v255_v9 = vstv %s1088_s9 }
  0x86   :  { %s1131_s13 = sld [smem:[#allocation10 + $0x52]]  ;;  %v275_v33 = vmul.f32 %v274_v23, %v1083_v24  ;;  %v282_v49 = vstv %s1115_s11  ;;  %v256_v23 = vmul.f32 %v255_v9, %v1200_v38 }
  0x87   :  { %s1137_s14 = sld [smem:[#allocation10 + $0x5c]]  ;;  %v272_v32 = vadd.f32 %v271_v21, %v268_v20  ;;  %v283_v58 = vmul.f32 %v282_v49, %v1108_v37  ;;  %v286_v63 = vstv %s1120_s12  ;;  %v249_v13 = vadd.f32 %v248_v61, %v245_v59 }
  0x88   :  { %s1141_s23 = sld [smem:[#allocation11 + $0x2]]  ;;  %v287_v12 = vmul.f32 %v286_v63, %v1133_v52  ;;  %v259_v49 = vstv %s1091_s19 }
  0x89   :  { %s1144_s3 = sld [smem:[#allocation13 + $0x2]]  ;;  %v278_v36 = vstv %s1110_s20  ;;  %v276_v45 = vadd.f32 %v275_v33, %v272_v32  ;;  %v253_v28 = vadd.f32 %v252_v8, %v249_v13 }
  0x8a   :  { %s1149_s15 = sld [smem:[#allocation10 + $0x3]]  ;;  %v279_v46 = vmul.f32 %v278_v36, %v1095_v30  ;;  %v290_v14 = vstv %s1123_s22 }
  0x8b   :  { %s1154_s16 = sld [smem:[#allocation10 + $0xd]]  ;;  %v291_v26 = vmul.f32 %v290_v14, %v1146_v60  ;;  %v294_v29 = vstv %s1127_s6 }
  0x8c   :  { %s1158_s24 = sld [smem:[#allocation10 + $0x17]]  ;;  %v280_v57 = vadd.f32 %v279_v46, %v276_v45  ;;  %v257_v45 = vadd.f32 %v256_v23, %v253_v28  ;;  %v298_v46 = vstv %s1131_s13 }
  0x8d   :  { %s1163_s26 = sld [smem:[#allocation10 + $0x21]]  ;;  %v299_v61 = vmul.f32 %v298_v46, %v1187_v27 }
  0x8e   :  { %s1169_s1 = sld [smem:[#allocation10 + $0x2b]]  ;;  %v284_v11 = vadd.f32 %v283_v58, %v280_v57  ;;  %v260_v63 = vadd.f32 %v259_v49, %v257_v45 }
  0x8f   :  { %s1173_s17 = sld [smem:[#allocation10 + $0x35]] }
  0x90   :  { %s1540_s0 = sld [smem:[#allocation20_spill]]  ;;  %v314_v42 = vstv %s1149_s15  ;;  %v288_v25 = vadd.f32 %v287_v12, %v284_v11 }
  0x91   :  { %s1178_s28 = sld [smem:[#allocation10 + $0x3f]]  ;;  %v317_v43 = vstv %s1154_s16  ;;  %v315_v51 = vmul.f32 %v314_v42, %v1066_v15  ;;  %v295_v42 = vmul.f32 %v294_v29, %v1165_v10 }
  0x92   :  { %s1182_s29 = sld [smem:[#allocation10 + $0x49]]  ;;  %v318_v53 = vmul.f32 %v317_v43, %v1068_v16  ;;  %v321_v56 = vstv %s1158_s24 }
  0x93   :  { %s1185_s18 = sld [smem:[#allocation10 + $0x53]]  ;;  %v322_v2 = vmul.f32 %v321_v56, %v1083_v24  ;;  %v325_v7 = vstv %s1163_s26 }
  0x94   :  { %s1190_s25 = sld [smem:[#allocation10 + $0x5d]]  ;;  %v319_v1 = vadd.f32 %v318_v53, %v315_v51  ;;  %v326_v20 = vmul.f32 %v325_v7, %v1095_v30  ;;  %v329_v22 = vstv %s1169_s1 }
  0x95   :  { %s1194_s4 = sld [smem:[#allocation11 + $0x3]]  ;;  %v330_v34 = vmul.f32 %v329_v22, %v1108_v37 }
  0x96   :  { %v204_v31 = vstv %s1540_s0  ;;  %s1198_s8 = sld [smem:[#allocation10 + $0x4]]  ;;  %v323_v19 = vadd.f32 %v322_v2, %v319_v1  ;;  %v302_v1 = vstv %s1137_s14 }
  0x97   :  { %s1203_s10 = sld [smem:[#allocation10 + $0xe]]  ;;  %v205_v41 = vmul.f32 %v204_v31, %v1187_v27  ;;  %v303_v14 = vmul.f32 %v302_v1, %v1200_v38 }
  0x98   :  { %s1208_s21 = sld [smem:[#allocation13 + $0x3]]  ;;  %v327_v33 = vadd.f32 %v326_v20, %v323_v19  ;;  %v261_v19 = vmax.f32 %v260_v63, 0.0 }
  0x99   :  { %s1212_s20 = sld [smem:[#allocation10 + $0x18]]  ;;  %v206_v54 = vadd.f32 %v205_v41, %v202_v40  ;;  %v333_v40 = vstv %s1173_s17  ;;  %v292_v41 = vadd.f32 %v291_v26, %v288_v25  ;;  %v345_v23 = vstv %s1185_s18 }
  0x9a   :  { %s1216_s30 = sld [smem:[#allocation10 + $0x22]]  ;;  %v331_v50 = vadd.f32 %v330_v34, %v327_v33  ;;  %v334_v51 = vmul.f32 %v333_v40, %v1133_v52 }
  0x9b   :  { %s1221_s7 = sld [smem:[#allocation10 + $0x2c]]  ;;  %v210_v5 = vadd.f32 %v209_v55, %v206_v54  ;;  %v337_v55 = vstv %s1178_s28  ;;  %v296_v59 = vadd.f32 %v295_v42, %v292_v41 }
  0x9c   :  { %s1225_s15 = sld [smem:[#allocation10 + $0x36]]  ;;  %v361_v3 = vstv %s1198_s8 }
  0x9d   :  { %s1228_s27 = sld [smem:[#allocation10 + $0x40]]  ;;  %v364_v4 = vstv %s1203_s10  ;;  %v362_v17 = vmul.f32 %v361_v3, %v1066_v15  ;;  %v213_v0 = vadd.f32 %v212_v6, %v210_v5  ;;  %v338_v5 = vmul.f32 %v337_v55, %v1146_v60 }
  0x9e   :  { %s1233_s11 = sld [smem:[#allocation10 + $0x4a]]  ;;  %v365_v18 = vmul.f32 %v364_v4, %v1068_v16  ;;  %v335_v4 = vadd.f32 %v334_v51, %v331_v50  ;;  %v341_v6 = vstv %s1182_s29  ;;  %v300_v13 = vadd.f32 %v299_v61, %v296_v59 }
  0x9f   :  { %s1238_s16 = sld [smem:[#allocation10 + $0x54]]  ;;  %v368_v21 = vstv %s1212_s20  ;;  %v214_v36 = vmax.f32 %v213_v0, 0.0  ;;  %v342_v20 = vmul.f32 %v341_v6, %v1165_v10  ;;  %v310_v59 = vstv %s1144_s3 }
  0xa0   :  { %s1242_s24 = sld [smem:[#allocation10 + $0x5e]]  ;;  %v366_v31 = vadd.f32 %v365_v18, %v362_v17  ;;  %v369_v32 = vmul.f32 %v368_v21, %v1083_v24  ;;  %v372_v35 = vstv %s1216_s30  ;;  %v306_v17 = vstv %s1141_s23 }
  0xa1   :  { %s1247_s2 = sld [smem:[#allocation10 + $0x5]]  ;;  %v373_v48 = vmul.f32 %v372_v35, %v1095_v30  ;;  %v376_v53 = vstv %s1221_s7  ;;  %v339_v22 = vadd.f32 %v338_v5, %v335_v4  ;;  %v304_v33 = vadd.f32 %v303_v14, %v300_v13 }
  0xa2   :  { %s1252_s5 = sld [smem:[#allocation10 + $0xf]]  ;;  %v370_v47 = vadd.f32 %v369_v32, %v366_v31  ;;  %v377_v3 = vmul.f32 %v376_v53, %v1108_v37  ;;  %v380_v7 = vstv %s1225_s15  ;;  %v353_v5 = vstv %s1194_s4 }
  0xa3   :  { %s1256_s9 = sld [smem:[#allocation11 + $0x4]]  ;;  %v381_v0 = vmul.f32 %v380_v7, %v1133_v52  ;;  %v384_v25 = vstv %s1228_s27  ;;  %v307_v55 = vadd.f32 %v306_v17, %v304_v33 }
  0xa4   :  { %s1541_s12 = sld [smem:[#allocation21_spill]]  ;;  %v374_v2 = vadd.f32 %v373_v48, %v370_v47  ;;  %v385_v40 = vmul.f32 %v384_v25, %v1146_v60  ;;  %v388_v45 = vstv %s1233_s11  ;;  %v349_v48 = vstv %s1190_s25 }
  0xa5   :  { %s1259_s26 = sld [smem:[#allocation13 + $0x4]]  ;;  %v392_v63 = vstv %s1238_s16 }
  0xa6   :  { %s1263_s22 = sld [smem:[#allocation10 + $0x19]]  ;;  %v378_v21 = vadd.f32 %v377_v3, %v374_v2  ;;  %v396_v2 = vstv %s1242_s24 }
  0xa7   :  { %s1267_s1 = sld [smem:[#allocation10 + $0x23]]  ;;  %v408_v43 = vstv %s1247_s2  ;;  %v397_v17 = vmul.f32 %v396_v2, %v1200_v38 }
  0xa8   :  { %s1271_s0 = sld [smem:[#allocation10 + $0x2d]]  ;;  %v411_v44 = vstv %s1252_s5  ;;  %v409_v56 = vmul.f32 %v408_v43, %v1066_v15  ;;  %v343_v43 = vadd.f32 %v342_v20, %v339_v22 }
  0xa9   :  { %s1275_s8 = sld [smem:[#allocation10 + $0x37]]  ;;  %v412_v57 = vmul.f32 %v411_v44, %v1068_v16  ;;  %v346_v44 = vmul.f32 %v345_v23, %v1187_v27 }
  0xaa   :  { %v216_v39 = vstv %s1541_s12  ;;  %s1280_s6 = sld [smem:[#allocation10 + $0x41]] }
  0xab   :  { %s1284_s10 = sld [smem:[#allocation10 + $0x4b]]  ;;  %v217_v54 = vmul.f32 %v216_v39, %v214_v36  ;;  %v413_v11 = vadd.f32 %v412_v57, %v409_v56  ;;  %v382_v39 = vadd.f32 %v381_v0, %v378_v21  ;;  %v389_v57 = vmul.f32 %v388_v45, %v1165_v10 }
  0xac   :  { %s1289_s17 = sld [smem:[#allocation10 + $0x55]]  ;;  %v415_v62 = vstv %s1263_s22  ;;  %v347_v61 = vadd.f32 %v346_v44, %v343_v43 }
  0xad   :  { %s1294_s13 = sld [smem:[#allocation10 + $0x5f]]  ;;  %v416_v12 = vmul.f32 %v415_v62, %v1083_v24  ;;  %v419_v18 = vstv %s1267_s1  ;;  %v386_v56 = vadd.f32 %v385_v40, %v382_v39  ;;  %v350_v62 = vmul.f32 %v349_v48, %v1200_v38 }
  0xae   :  { %s1542_s19 = sld [smem:[#allocation23_spill]]  ;;  %v420_v29 = vmul.f32 %v419_v18, %v1095_v30  ;;  %v423_v34 = vstv %s1271_s0 }
  0xaf   :  { %s1543_s2 = sld [smem:[#allocation22_spill]]  ;;  %v417_v28 = vadd.f32 %v416_v12, %v413_v11  ;;  %v424_v50 = vmul.f32 %v423_v34, %v1108_v37  ;;  %v427_v51 = vstv %s1275_s8  ;;  %v308_v11 = vmax.f32 %v307_v55, 0.0 }
  0xb0   :  { %s1301_s7 = sld [smem:[#allocation10 + $0x6]]  ;;  %v428_v4 = vmul.f32 %v427_v51, %v1133_v52  ;;  %v431_v6 = vstv %s1280_s6  ;;  %v390_v12 = vadd.f32 %v389_v57, %v386_v56  ;;  %v351_v14 = vadd.f32 %v350_v62, %v347_v61 }
  0xb1   :  { %s1305_s28 = sld [smem:[#allocation10 + $0x10]]  ;;  %v421_v49 = vadd.f32 %v420_v29, %v417_v28  ;;  %v435_v18 = vstv %s1284_s10  ;;  %v432_v21 = vmul.f32 %v431_v6, %v1146_v60  ;;  %v311_v34 = vmul.f32 %v310_v59, %v308_v11 }
  0xb2   :  { %s1310_s5 = sld [smem:[#allocation10 + $0x1a]]  ;;  %v354_v48 = vadd.f32 %v353_v5, %v351_v14  ;;  %v404_v62 = vstv %s1259_s26 }
  0xb3   :  { %s1314_s14 = sld [smem:[#allocation10 + $0x24]]  ;;  %v425_v3 = vadd.f32 %v424_v50, %v421_v49  ;;  %v357_v49 = vstv %s1208_s21  ;;  %v443_v61 = vstv %s1294_s13 }
  0xb4   :  { %v171_v58 = vstv %s1542_s19  ;;  %s1319_s29 = sld [smem:[#allocation11 + $0x5]] }
  0xb5   :  { %v218_v8 = vadd.f32 %v217_v54, %v171_v58  ;;  %v263_v9 = vstv %s1543_s2  ;;  %s1323_s15 = sld [smem:[#allocation10 + $0x2e]]  ;;  %v429_v20 = vadd.f32 %v428_v4, %v425_v3  ;;  %v355_v4 = vmax.f32 %v354_v48, 0.0 }
  0xb6   :  { %s1327_s12 = sld [smem:[#allocation13 + $0x5]]  ;;  %v455_v26 = vstv %s1301_s7  ;;  %v264_v47 = vmul.f32 %v263_v9, %v261_v19 }
  0xb7   :  { %v456_v31 = vmul.f32 %v455_v26, %v1066_v15  ;;  %v458_v32 = vstv %s1305_s28  ;;  %s1333_s23 = sld [smem:[#allocation10 + $0x38]]  ;;  %v433_v40 = vadd.f32 %v432_v21, %v429_v20 }
  0xb8   :  { %v459_v35 = vmul.f32 %v458_v32, %v1068_v16  ;;  %v462_v36 = vstv %s1310_s5  ;;  %s1338_s18 = sld [smem:[#allocation10 + $0x42]]  ;;  %v265_v1 = vadd.f32 %v264_v47, %v218_v8  ;;  %v393_v8 = vmul.f32 %v392_v63, %v1187_v27 }
  0xb9   :  { %v463_v41 = vmul.f32 %v462_v36, %v1083_v24  ;;  %v466_v42 = vstv %s1314_s14  ;;  %s1343_s27 = sld [smem:[#allocation10 + $0x4c]] }
  0xba   :  { %v460_v46 = vadd.f32 %v459_v35, %v456_v31  ;;  %s1347_s22 = sld [smem:[#allocation10 + $0x56]]  ;;  %v467_v54 = vmul.f32 %v466_v42, %v1095_v30  ;;  %v394_v29 = vadd.f32 %v393_v8, %v390_v12  ;;  %v436_v35 = vmul.f32 %v435_v18, %v1165_v10 }
  0xbb   :  { %s1351_s1 = sld [smem:[#allocation10 + $0x60]]  ;;  %v470_v58 = vstv %s1323_s15  ;;  %v312_v57 = vadd.f32 %v311_v34, %v265_v1 }
  0xbc   :  { %v464_v53 = vadd.f32 %v463_v41, %v460_v46  ;;  %s1355_s0 = sld [smem:[#allocation10 + $0x7]]  ;;  %v471_v9 = vmul.f32 %v470_v58, %v1108_v37  ;;  %v439_v41 = vstv %s1289_s17  ;;  %v398_v50 = vadd.f32 %v397_v17, %v394_v29 }
  0xbd   :  { %s1359_s25 = sld [smem:[#allocation10 + $0x11]]  ;;  %v474_v13 = vstv %s1333_s23  ;;  %v437_v58 = vadd.f32 %v436_v35, %v433_v40  ;;  %v440_v59 = vmul.f32 %v439_v41, %v1187_v27 }
  0xbe   :  { %s1364_s11 = sld [smem:[#allocation10 + $0x1b]]  ;;  %v468_v7 = vadd.f32 %v467_v54, %v464_v53  ;;  %v475_v25 = vmul.f32 %v474_v13, %v1133_v52  ;;  %v478_v31 = vstv %s1338_s18  ;;  %v400_v53 = vstv %s1256_s9 }
  0xbf   :  { %s1368_s8 = sld [smem:[#allocation10 + $0x25]]  ;;  %v479_v45 = vmul.f32 %v478_v31, %v1146_v60  ;;  %v482_v51 = vstv %s1343_s27  ;;  %v401_v5 = vadd.f32 %v400_v53, %v398_v50  ;;  %v441_v8 = vadd.f32 %v440_v59, %v437_v58 }
  0xc0   :  { %s1373_s3 = sld [smem:[#allocation10 + $0x2f]]  ;;  %v472_v23 = vadd.f32 %v471_v9, %v468_v7  ;;  %v483_v2 = vmul.f32 %v482_v51, %v1165_v10  ;;  %v486_v1 = vstv %s1347_s22  ;;  %v444_v7 = vmul.f32 %v443_v61, %v1200_v38 }
  0xc1   :  { %s1377_s16 = sld [smem:[#allocation10 + $0x39]]  ;;  %v490_v13 = vstv %s1351_s1 }
  0xc2   :  { %v502_v19 = vstv %s1355_s0  ;;  %s1382_s4 = sld [smem:[#allocation10 + $0x43]]  ;;  %v476_v44 = vadd.f32 %v475_v25, %v472_v23 }
  0xc3   :  { %s1385_s24 = sld [smem:[#allocation11 + $0x6]]  ;;  %v503_v0 = vmul.f32 %v502_v19, %v1066_v15  ;;  %v505_v22 = vstv %s1359_s25  ;;  %v487_v19 = vmul.f32 %v486_v1, %v1187_v27 }
  0xc4   :  { %s1390_s6 = sld [smem:[#allocation13 + $0x6]]  ;;  %v506_v26 = vmul.f32 %v505_v22, %v1068_v16  ;;  %v509_v28 = vstv %s1364_s11  ;;  %v480_v63 = vadd.f32 %v479_v45, %v476_v44 }
  0xc5   :  { %v510_v32 = vmul.f32 %v509_v28, %v1083_v24  ;;  %v513_v33 = vstv %s1368_s8  ;;  %s1397_s10 = sld [smem:[#allocation10 + $0x4d]] }
  0xc6   :  { %v507_v36 = vadd.f32 %v506_v26, %v503_v0  ;;  %v514_v39 = vmul.f32 %v513_v33, %v1095_v30  ;;  %s1401_s20 = sld [smem:[#allocation10 + $0x57]]  ;;  %v517_v42 = vstv %s1373_s3  ;;  %v484_v18 = vadd.f32 %v483_v2, %v480_v63 }
  0xc7   :  { %v521_v43 = vstv %s1377_s16  ;;  %s1406_s30 = sld [smem:[#allocation10 + $0x61]]  ;;  %v518_v47 = vmul.f32 %v517_v42, %v1108_v37  ;;  %v358_v26 = vmul.f32 %v357_v49, %v355_v4  ;;  %v447_v33 = vstv %s1319_s29 }
  0xc8   :  { %v511_v46 = vadd.f32 %v510_v32, %v507_v36  ;;  %s1410_s19 = sld [smem:[#allocation10 + $0x8]]  ;;  %v522_v55 = vmul.f32 %v521_v43, %v1133_v52  ;;  %v525_v56 = vstv %s1382_s4  ;;  %v445_v32 = vadd.f32 %v444_v7, %v441_v8 }
  0xc9   :  { %s1414_s17 = sld [smem:[#allocation10 + $0x12]]  ;;  %v526_v6 = vmul.f32 %v525_v56, %v1146_v60  ;;  %v402_v36 = vmax.f32 %v401_v5, 0.0  ;;  %v488_v42 = vadd.f32 %v487_v19, %v484_v18  ;;  %v359_v49 = vadd.f32 %v358_v26, %v312_v57 }
  0xca   :  { %v515_v54 = vadd.f32 %v514_v39, %v511_v46  ;;  %s1419_s2 = sld [smem:[#allocation10 + $0x1c]]  ;;  %v491_v39 = vmul.f32 %v490_v13, %v1200_v38  ;;  %v448_v50 = vadd.f32 %v447_v33, %v445_v32  ;;  %v494_v63 = vstv %s1385_s24  ;;  %s919_s24 = smov [#allocation14]  }
  0xcb   :  { %s1423_s21 = sld [smem:[#allocation10 + $0x26]]  ;;  %v529_v11 = vstv %s1397_s10  ;;  %v405_v53 = vmul.f32 %v404_v62, %v402_v36 }
  0xcc   :  { %v519_v3 = vadd.f32 %v518_v47, %v515_v54  ;;  %s1427_s9 = sld [smem:[#allocation10 + $0x30]]  ;;  %v530_v22 = vmul.f32 %v529_v11, %v1165_v10  ;;  %v533_v28 = vstv %s1401_s20  ;;  %v451_v54 = vstv %s1327_s12 }
  0xcd   :  { %s1431_s7 = sld [smem:[#allocation10 + $0x3a]]  ;;  %v534_v44 = vmul.f32 %v533_v28, %v1187_v27  ;;  %v537_v46 = vstv %s1406_s30  ;;  %v492_v58 = vadd.f32 %v491_v39, %v488_v42  ;;  %v449_v4 = vmax.f32 %v448_v50, 0.0 }
  0xce   :  { %v523_v9 = vadd.f32 %v522_v55, %v519_v3  ;;  %v549_v12 = vstv %s1410_s19  ;;  %s1436_s26 = sld [smem:[#allocation10 + $0x44]]  ;;  %v538_v61 = vmul.f32 %v537_v46, %v1200_v38 }
  0xcf   :  { %v550_v14 = vmul.f32 %v549_v12, %v1066_v15  ;;  %v552_v17 = vstv %s1414_s17  ;;  %s1441_s13 = sld [smem:[#allocation10 + $0x4e]]  ;;  %v495_v8 = vadd.f32 %v494_v63, %v492_v58  ;;  %v452_v26 = vmul.f32 %v451_v54, %v449_v4 }
  0xd0   :  { %s1444_s28 = sld [smem:[#allocation11 + $0x7]]  ;;  %v553_v20 = vmul.f32 %v552_v17, %v1068_v16  ;;  %v556_v21 = vstv %s1419_s2  ;;  %v527_v0 = vadd.f32 %v526_v6, %v523_v9 }
  0xd1   :  { %v557_v23 = vmul.f32 %v556_v21, %v1083_v24  ;;  %v560_v25 = vstv %s1423_s21  ;;  %s1451_s5 = sld [smem:[#allocation10 + $0x58]]  ;;  %v496_v28 = vmax.f32 %v495_v8, 0.0 }
  0xd2   :  { %v554_v29 = vadd.f32 %v553_v20, %v550_v14  ;;  %v561_v31 = vmul.f32 %v560_v25, %v1095_v30  ;;  %s1455_s14 = sld [smem:[#allocation10 + $0x62]]  ;;  %v564_v34 = vstv %s1427_s9  ;;  %v531_v43 = vadd.f32 %v530_v22, %v527_v0 }
  0xd3   :  { %v568_v35 = vstv %s1431_s7  ;;  %s1460_s15 = sld [smem:[#allocation11 + $0x8]]  ;;  %v565_v41 = vmul.f32 %v564_v34, %v1108_v37 }
  0xd4   :  { %v558_v40 = vadd.f32 %v557_v23, %v554_v29  ;;  %s1464_s23 = sld [smem:[#allocation10 + $0x9]]  ;;  %v572_v45 = vstv %s1436_s26  ;;  %v569_v48 = vmul.f32 %v568_v35, %v1133_v52  ;;  %v535_v59 = vadd.f32 %v534_v44, %v531_v43 }
  0xd5   :  { %s1468_s29 = sld [smem:[#allocation10 + $0x13]]  ;;  %v576_v51 = vstv %s1441_s13  ;;  %v573_v56 = vmul.f32 %v572_v45, %v1146_v60  ;;  %v498_v29 = vstv %s1390_s6  ;;  %s649_s6 = sshll.u32 %s919_s24, 4  ;;  %s650_s6 = int_to_ptr.vmem [resolvable:$true] %s649_s6 }
  0xd6   :  { %v562_v47 = vadd.f32 %v561_v31, %v558_v40  ;;  %s1472_s18 = sld [smem:[#allocation10 + $0x1d]]  ;;  %v577_v62 = vmul.f32 %v576_v51, %v1165_v10  ;;  %v539_v13 = vadd.f32 %v538_v61, %v535_v59  ;;  %v541_v21 = vstv %s1444_s28  ;;  %s883_s10 = scalar_lea.vmem %s650_s6, 128 }
  0xd7   :  { %s1475_s27 = sld [smem:[#allocation10 + $0x27]]  ;;  %v580_v57 = vstv %s1451_s5  ;;  %p884_p2 = scmp.ne.s32.totalorder %s650_s6, %s883_s10 }
  0xd8   :  { %v566_v55 = vadd.f32 %v565_v41, %v562_v47  ;;  %s1479_s22 = sld [smem:[#allocation10 + $0x31]]  ;;  %v584_v5 = vstv %s1455_s14  ;;  %v581_v9 = vmul.f32 %v580_v57, %v1187_v27  ;;  %v542_v32 = vadd.f32 %v541_v21, %v539_v13  ;;  %p888_p3 = scmp.lt.s32.totalorder %s650_s6, %s650_s6 }
  0xd9   :  { %s1483_s1 = sld [smem:[#allocation10 + $0x3b]]  ;;  %v585_v18 = vmul.f32 %v584_v5, %v1200_v38  ;;  %v588_v35 = vstv %s1460_s15  ;;  %p889_p4 = scmp.lt.s32.totalorder %s883_s10, %s883_s10 }
  0xda   :  { %v570_v2 = vadd.f32 %v569_v48, %v566_v55  ;;  %v596_v3 = vstv %s1464_s23  ;;  %s1488_s12 = sld [smem:[#allocation10 + $0x45]]  ;;  %v543_v43 = vmax.f32 %v542_v32, 0.0 }
  0xdb   :  { %v597_v1 = vmul.f32 %v596_v3, %v1066_v15  ;;  %v599_v6 = vstv %s1468_s29  ;;  %s1493_s0 = sld [smem:[#allocation10 + $0x4f]]  ;;  %p890_p5 = por %p889_p4, %p888_p3 }
  0xdc   :  { %v574_v7 = vadd.f32 %v573_v56, %v570_v2  ;;  %v600_v11 = vmul.f32 %v599_v6, %v1068_v16  ;;  %v603_v12 = vstv %s1472_s18  ;;  %s1500_s25 = sld [smem:[#allocation10 + $0x59]] }
  0xdd   :  { %v604_v14 = vmul.f32 %v603_v12, %v1083_v24  ;;  %v607_v17 = vstv %s1475_s27  ;;  %s1502_s11 = sld [smem:[#allocation13 + $0x7]]  ;;  %v406_v24 = vadd.f32 %v405_v53, %v359_v49  ;;  %p891_p6 = pnand %p890_p5, %p884_p2 }
  0xde   :  { %v578_v15 = vadd.f32 %v577_v62, %v574_v7  ;;  %v601_v19 = vadd.f32 %v600_v11, %v597_v1  ;;  %v608_v20 = vmul.f32 %v607_v17, %v1095_v30  ;;  %v611_v16 = vstv %s1479_s22  ;;  %s1509_s8 = sld [smem:[#allocation10 + $0x63]] }
  0xdf   :  { %v615_v0 = vstv %s1483_s1  ;;  %v612_v25 = vmul.f32 %v611_v16, %v1108_v37  ;;  %s783_s3 = sld [smem:[#allocation13 + $0x8]]  ;;  %v453_v41 = vadd.f32 %v452_v26, %v406_v24  ;;  %v499_v37 = vmul.f32 %v498_v29, %v496_v28 }
  0xe0   :  { %v582_v22 = vadd.f32 %v581_v9, %v578_v15  ;;  %v605_v23 = vadd.f32 %v604_v14, %v601_v19  ;;  %v619_v31 = vstv %s1488_s12  ;;  %v616_v34 = vmul.f32 %v615_v0, %v1133_v52  ;;  %s794_s16 = sld [smem:[#allocation11 + $0x9]] }
  0xe1   :  { %v623_v36 = vstv %s1493_s0  ;;  %v620_v40 = vmul.f32 %v619_v31, %v1146_v60  ;;  %v500_v50 = vadd.f32 %v499_v37, %v453_v41  ;;  %s795_s4 = sld [smem:[#allocation13 + $0x9]] }
  0xe2   :  { %v586_v33 = vadd.f32 %v585_v18, %v582_v22  ;;  %v609_v30 = vadd.f32 %v608_v20, %v605_v23  ;;  %v627_v42 = vstv %s1500_s25  ;;  %v624_v46 = vmul.f32 %v623_v36, %v1165_v10 }
  0xe3   :  { %v545_v47 = vstv %s1502_s11  ;;  %v628_v52 = vmul.f32 %v627_v42, %v1187_v27 }
  0xe4   :  { %v613_v39 = vadd.f32 %v612_v25, %v609_v30  ;;  %v589_v44 = vadd.f32 %v588_v35, %v586_v33  ;;  %v631_v48 = vstv %s1509_s8  ;;  %v546_v51 = vmul.f32 %v545_v47, %v543_v43 }
  0xe5   :  { %v632_v60 = vmul.f32 %v631_v48, %v1200_v38  ;;  %v592_v55 = vstv %s783_s3 }
  0xe6   :  { %v617_v45 = vadd.f32 %v616_v34, %v613_v39  ;;  %v590_v53 = vmax.f32 %v589_v44, 0.0  ;;  %v635_v58 = vstv %s794_s16  ;;  %v547_v59 = vadd.f32 %v546_v51, %v500_v50 }
  0xe7   :  { %v639_v10 = vstv %s795_s4 }
  0xe8   :  { %v621_v49 = vadd.f32 %v620_v40, %v617_v45  ;;  %v593_v61 = vmul.f32 %v592_v55, %v590_v53 }
  0xea   :  { %v625_v54 = vadd.f32 %v624_v46, %v621_v49  ;;  %v594_v2 = vadd.f32 %v593_v61, %v547_v59 }
  0xec   :  { %v629_v56 = vadd.f32 %v628_v52, %v625_v54 }
  0xee   :  { %v633_v57 = vadd.f32 %v632_v60, %v629_v56 }
  0xf0   :  { %v636_v63 = vadd.f32 %v635_v58, %v633_v57 }
  0xf2   :  { %v637_v62 = vmax.f32 %v636_v63, 0.0 }
  0xf4   :  { %v640_v27 = vmul.f32 %v639_v10, %v637_v62 }
  0xf6   :  { %v641_v3 = vadd.f32 %v640_v27, %v594_v2 }
  0xf8   :  { %642 = vst [vmem:[#allocation14] sm:$0xff] %v641_v3 }
  0xf9   :  { %894 = shalt.err (!%p891_p6)
}
  0xfa   :  { %s1544_s19 = sld [smem:[#allocation24_spill]] }
 0x100   :  { %652 = dma.vmem_to_hbm [thread:$0]  %s650_s6, 128, %s1544_s19, [#allocation5]  }
 0x101   :  { %911 = dma.done.wait [#allocation5], 128  }
 0x102   :  { %912 = vsyncadd [#allocation5], 4294967168 }
 0x103   :  { %656 = vsyncpa [#allocation4], 1 }
 0x104   :  { %657 = vsyncpa [#allocation5], 1 }
 0x105   :  { %658 = vsyncpa [#allocation6], 1 }
 0x106   :  { %659 = vsyncpa [#allocation9], 1 }
 0x107   :  { %660 = vsyncpa [#allocation12], 1 }

</bundles_post_ra>
